<compile_context>
chip_gen: v7x
topology: tpu7x:2x2x1
jax: 0.10.0
libtpu: 0.0.40
codegen_flags: <defaults>
</compile_context>

<pallas_src>
import functools
import math

import jax
import jax.numpy as jnp
from jax.experimental import pallas as pl
from jax.experimental.pallas import tpu as pltpu


def _round_up(v, m):
    return -(-v // m) * m


# ------------------------------- fused kernel -------------------------------

def _vit_fused_kernel(patches_ref, pos_ref, ew_ref, eb_ref,
                      g1_ref, be1_ref, wqkv_ref, bqkv_ref, wo_ref, bo_ref,
                      g2_ref, be2_ref, w1_ref, bb1_ref, w2_ref, bb2_ref,
                      dw_ref, db_ref,
                      rec_ref, amap_ref,
                      tok_ref,
                      *, num_layers, num_heads, head_dim, embed_dim,
                      batch, n_tok):
    l = pl.program_id(0)                       # layer index (sequential axis)
    E = embed_dim
    Dh = head_dim
    H = num_heads
    BN = batch * n_tok
    scale = 1.0 / math.sqrt(Dh)
    f32 = jnp.float32
    bf16 = jnp.bfloat16

    def _ln(xx, g, b):
        # two-pass LayerNorm in f32 (matches PyTorch eps=1e-5)
        mu = jnp.mean(xx, axis=-1, keepdims=True)
        d = xx - mu
        var = jnp.mean(d * d, axis=-1, keepdims=True)
        return d * jax.lax.rsqrt(var + 1e-5) * g + b

    # ---- ViTEmbedding (first grid step only): patch proj + pos emb ---------
    @pl.when(l == 0)
    def _():
        emb = jnp.dot(patches_ref[...], ew_ref[...],
                      preferred_element_type=f32) + eb_ref[...]
        tok_ref[...] = emb + pos_ref[...]

    x = tok_ref[...]                                             # (B*N, E) f32

    # --------------------------- pre-norm MHA -------------------------------
    h1 = _ln(x, g1_ref[...], be1_ref[...])
    qkv = jnp.dot(h1.astype(bf16), wqkv_ref[...],
                  preferred_element_type=f32) + bqkv_ref[...]    # (B*N, 3E)
    qkv3 = qkv.reshape(batch, n_tok, 3 * E)                      # per-batch view

    head_outs = []
    probs = []
    for hd in range(H):
        lo = hd * Dh
        qh = (qkv3[:, :, lo:lo + Dh] * scale).astype(bf16)       # (B, N, Dh)
        kh = qkv3[:, :, E + lo:E + lo + Dh].astype(bf16)
        vh = qkv3[:, :, 2 * E + lo:2 * E + lo + Dh].astype(bf16)

        s = jnp.einsum('bqd,bkd->bqk', qh, kh,
                       preferred_element_type=f32)               # (B, N, N)
        s = s - jnp.max(s, axis=-1, keepdims=True)
        e = jnp.exp(s)
        p = e / jnp.sum(e, axis=-1, keepdims=True)               # exact softmax
        probs.append(p)
        head_outs.append(jnp.einsum('bqk,bkd->bqd', p.astype(bf16), vh,
                                    preferred_element_type=f32))

    # concat heads -> one full-K out-projection matmul (no K=8 matmuls)
    o = jnp.concatenate(head_outs, axis=-1).reshape(BN, E)
    x = x + jnp.dot(o.astype(bf16), wo_ref[...],
                    preferred_element_type=f32) + bo_ref[...]    # residual 1

    # --------------------------------- FFN ----------------------------------
    h2 = _ln(x, g2_ref[...], be2_ref[...])
    hh = jnp.dot(h2.astype(bf16), w1_ref[...],
                 preferred_element_type=f32) + bb1_ref[...]
    hh = jnp.maximum(hh, 0.0)                                    # ReLU default
    x = x + jnp.dot(hh.astype(bf16), w2_ref[...],
                    preferred_element_type=f32) + bb2_ref[...]   # residual 2
    tok_ref[...] = x

    # ---- ViTDecoder (last grid step): reconstruction + attention map -------
    @pl.when(l == num_layers - 1)
    def _():
        rec_ref[...] = jnp.dot(x.astype(bf16), dw_ref[...],
                               preferred_element_type=f32) + db_ref[...]
        # attention map: last layer's probs, averaged over heads and queries.
        psum = jnp.zeros((batch, n_tok), f32)
        for p in probs:
            psum = psum + jnp.sum(p, axis=1)                     # (B, N)
        amap = psum * (1.0 / (H * n_tok))
        pad = amap_ref.shape[-1] - n_tok
        if pad > 0:                                              # lane-dense store
            amap = jnp.concatenate(
                [amap, jnp.zeros((batch, pad), f32)], axis=-1)
        amap_ref[...] = amap


# ------------------------------ forward wrapper ------------------------------

def vit_block_forward(x, params, *, patch_h, patch_w, num_heads, num_layers):
    B, C, H, W = x.shape
    nh, nw = H // patch_h, W // patch_w
    N = nh * nw
    P = C * patch_h * patch_w
    E = params['pos_emb'].shape[-1]
    Dh = E // num_heads
    BN = B * N
    P_pad = _round_up(max(P, 128), 128)      # lane-dense reconstruction slab
    N_pad = _round_up(max(N, 128), 128)      # lane-dense attention-map slab
    bf = jnp.bfloat16

    # patchify (pure layout glue) + bf16 cast of the largest input
    patches = x.reshape(B, C, nh, patch_h, nw, patch_w)
    patches = patches.transpose(0, 2, 4, 1, 3, 5).reshape(BN, P).astype(bf)

    # positional embedding tiled over batch so the kernel adds it elementwise
    pos = jnp.tile(params['pos_emb'], (B, 1))                    # (B*N, E) f32

    # decoder weight/bias zero-padded to a 128-lane multiple (wrapper slices back)
    dec_w = jnp.zeros((E, P_pad), jnp.float32).at[:, :P].set(
        params['dec_w']).astype(bf)
    dec_b = jnp.zeros((1, P_pad), jnp.float32).at[0, :P].set(params['dec_b'])

    kernel = functools.partial(_vit_fused_kernel,
                               num_layers=num_layers, num_heads=num_heads,
                               head_dim=Dh, embed_dim=E, batch=B, n_tok=N)

    per_layer3 = lambda l: (l, 0, 0)
    const2 = lambda l: (0, 0)

    in_specs = [
        pl.BlockSpec((BN, P), const2),                  # patches (bf16)
        pl.BlockSpec((BN, E), const2),                  # pos_emb (tiled)
        pl.BlockSpec((P, E), const2),                   # embed_w
        pl.BlockSpec((1, E), const2),                   # embed_b
        pl.BlockSpec((None, 1, E), per_layer3),         # ln1_g
        pl.BlockSpec((None, 1, E), per_layer3),         # ln1_b
        pl.BlockSpec((None, E, 3 * E), per_layer3),     # wqkv (fused Q,K,V)
        pl.BlockSpec((None, 1, 3 * E), per_layer3),     # bqkv
        pl.BlockSpec((None, E, E), per_layer3),         # wo
        pl.BlockSpec((None, 1, E), per_layer3),         # bo
        pl.BlockSpec((None, 1, E), per_layer3),         # ln2_g
        pl.BlockSpec((None, 1, E), per_layer3),         # ln2_b
        pl.BlockSpec((None, E, 4 * E), per_layer3),     # w1
        pl.BlockSpec((None, 1, 4 * E), per_layer3),     # b1
        pl.BlockSpec((None, 4 * E, E), per_layer3),     # w2
        pl.BlockSpec((None, 1, E), per_layer3),         # b2
        pl.BlockSpec((E, P_pad), const2),               # dec_w (padded)
        pl.BlockSpec((1, P_pad), const2),               # dec_b (padded)
    ]
    out_specs = (
        pl.BlockSpec((BN, P_pad), const2),              # reconstruction slab
        pl.BlockSpec((B, N_pad), const2),               # attention map slab
    )

    # NOTE: on v7x (2 TensorCores) one could add a leading size-2 "parallel"
    # batch grid axis; on v5e/v6e a single fused sequential layer axis minimizes
    # weight DMA and grid-step overhead.  For scaled-up configs on v6e raise
    # vmem_limit_bytes; on v7x tile the FFN weights instead.
    rec, amap = pl.pallas_call(
        kernel,
        out_shape=(jax.ShapeDtypeStruct((BN, P_pad), jnp.float32),
                   jax.ShapeDtypeStruct((B, N_pad), jnp.float32)),
        grid=(num_layers,),
        in_specs=in_specs,
        out_specs=out_specs,
        scratch_shapes=[pltpu.VMEM((BN, E), jnp.float32)],   # resident tokens
        compiler_params=pltpu.CompilerParams(
            dimension_semantics=("arbitrary",),
            vmem_limit_bytes=32 * 1024 * 1024),
    )(patches, pos,
      params['embed_w'].astype(bf), params['embed_b'].reshape(1, E),
      params['ln1_g'], params['ln1_b'],
      params['wqkv'].astype(bf), params['bqkv'],
      params['wo'].astype(bf), params['bo'],
      params['ln2_g'], params['ln2_b'],
      params['w1'].astype(bf), params['b1'],
      params['w2'].astype(bf), params['b2'],
      dec_w, dec_b)

    # un-patchify (pure layout glue), drop lane padding
    rec = rec[:, :P].reshape(B, nh, nw, C, patch_h, patch_w)
    rec = rec.transpose(0, 3, 1, 4, 2, 5).reshape(B, C, H, W)

    # nearest-upsample the per-patch saliency to the input resolution
    sal = amap[:, :N].reshape(B, 1, nh, nw)
    sal = jnp.repeat(jnp.repeat(sal, patch_h, axis=2), patch_w, axis=3)
    return rec, sal


# --------------------------- deterministic params ---------------------------

def init_params(key, C, H, W, ph, pw, E, num_layers, num_heads):
    P = C * ph * pw
    N = (H // ph) * (W // pw)
    hidden = 4 * E
    L = num_layers
    keys = jax.random.split(key, 7)

    def w_init(k, shape):
        return (0.02 * jax.random.normal(k, shape)).astype(jnp.float32)

    return {
        'embed_w': w_init(keys[0], (P, E)),
        'embed_b': jnp.zeros((E,), jnp.float32),
        'pos_emb': w_init(keys[1], (N, E)),
        'dec_w': w_init(keys[2], (E, P)),
        'dec_b': jnp.zeros((P,), jnp.float32),
        'ln1_g': jnp.ones((L, 1, E), jnp.float32),
        'ln1_b': jnp.zeros((L, 1, E), jnp.float32),
        'wqkv': w_init(keys[3], (L, E, 3 * E)),
        'bqkv': jnp.zeros((L, 1, 3 * E), jnp.float32),
        'wo': w_init(keys[4], (L, E, E)),
        'bo': jnp.zeros((L, 1, E), jnp.float32),
        'ln2_g': jnp.ones((L, 1, E), jnp.float32),
        'ln2_b': jnp.zeros((L, 1, E), jnp.float32),
        'w1': w_init(keys[5], (L, E, hidden)),
        'b1': jnp.zeros((L, 1, hidden), jnp.float32),
        'w2': w_init(keys[6], (L, hidden, E)),
        'b2': jnp.zeros((L, 1, E), jnp.float32),
    }


# ---------------------------------- main ------------------------------------

if __name__ == "__main__":
    # ViTBlock(input_channels=4, input_height=16, input_width=16,
    #          patch_height=4, patch_width=4, embed_dim=32,
    #          num_layers=2, num_heads=4, activation='ReLU')
    B, C, H, W = 2, 4, 16, 16
    ph = pw = 4
    embed_dim = 32
    num_layers = 2
    num_heads = 4

    key = jax.random.PRNGKey(0)
    k_x, k_p = jax.random.split(key)
    x = jax.random.normal(k_x, (B, C, H, W), jnp.float32)
    params = init_params(k_p, C, H, W, ph, pw, embed_dim, num_layers, num_heads)

    fwd = jax.jit(functools.partial(vit_block_forward, patch_h=ph, patch_w=pw,
                                    num_heads=num_heads, num_layers=num_layers))
    out, attn_map = fwd(x, params)
    jax.block_until_ready((out, attn_map))

    assert out.shape == (B, C, H, W), out.shape
    assert attn_map.shape == (B, 1, H, W), attn_map.shape
    assert jnp.all(jnp.isfinite(out)) and jnp.all(jnp.isfinite(attn_map))
    print("KERNEL_OK")
</pallas_src>

<mosaic_0001>
module attributes {stable_mosaic.version = 11 : i64} {
  func.func @_vit_fused_kernel(%arg0: i32, %arg1: memref<32x64xbf16, #tpu.memory_space<vmem>>, %arg2: memref<32x32xf32, #tpu.memory_space<vmem>>, %arg3: memref<64x32xbf16, #tpu.memory_space<vmem>>, %arg4: memref<1x32xf32, #tpu.memory_space<vmem>>, %arg5: memref<1x1x32xf32, #tpu.memory_space<vmem>>, %arg6: memref<1x1x32xf32, #tpu.memory_space<vmem>>, %arg7: memref<1x32x96xbf16, #tpu.memory_space<vmem>>, %arg8: memref<1x1x96xf32, #tpu.memory_space<vmem>>, %arg9: memref<1x32x32xbf16, #tpu.memory_space<vmem>>, %arg10: memref<1x1x32xf32, #tpu.memory_space<vmem>>, %arg11: memref<1x1x32xf32, #tpu.memory_space<vmem>>, %arg12: memref<1x1x32xf32, #tpu.memory_space<vmem>>, %arg13: memref<1x32x128xbf16, #tpu.memory_space<vmem>>, %arg14: memref<1x1x128xf32, #tpu.memory_space<vmem>>, %arg15: memref<1x128x32xbf16, #tpu.memory_space<vmem>>, %arg16: memref<1x1x32xf32, #tpu.memory_space<vmem>>, %arg17: memref<32x128xbf16, #tpu.memory_space<vmem>>, %arg18: memref<1x128xf32, #tpu.memory_space<vmem>>, %arg19: memref<32x128xf32, #tpu.memory_space<vmem>>, %arg20: memref<2x128xf32, #tpu.memory_space<vmem>>, %arg21: memref<32x32xf32, #tpu.memory_space<vmem>>) attributes {dimension_semantics = [#tpu.dimension_semantics<arbitrary>], iteration_bounds = array<i64: 2>, scalar_prefetch = 0 : i64, scratch_operands = 1 : i64, tpu.core_type = #tpu.core_type<tc>, window_params = [{pipeline_mode = #tpu.pipeline_mode<synchronous>, transform_indices = @transform_0, window_bounds = array<i64: 32, 64>}, {pipeline_mode = #tpu.pipeline_mode<synchronous>, transform_indices = @transform_1, window_bounds = array<i64: 32, 32>}, {pipeline_mode = #tpu.pipeline_mode<synchronous>, transform_indices = @transform_2, window_bounds = array<i64: 64, 32>}, {pipeline_mode = #tpu.pipeline_mode<synchronous>, transform_indices = @transform_3, window_bounds = array<i64: 1, 32>}, {transform_indices = @transform_4, window_bounds = array<i64: 1, 1, 32>}, {transform_indices = @transform_5, window_bounds = array<i64: 1, 1, 32>}, {transform_indices = @transform_6, window_bounds = array<i64: 1, 32, 96>}, {transform_indices = @transform_7, window_bounds = array<i64: 1, 1, 96>}, {transform_indices = @transform_8, window_bounds = array<i64: 1, 32, 32>}, {transform_indices = @transform_9, window_bounds = array<i64: 1, 1, 32>}, {transform_indices = @transform_10, window_bounds = array<i64: 1, 1, 32>}, {transform_indices = @transform_11, window_bounds = array<i64: 1, 1, 32>}, {transform_indices = @transform_12, window_bounds = array<i64: 1, 32, 128>}, {transform_indices = @transform_13, window_bounds = array<i64: 1, 1, 128>}, {transform_indices = @transform_14, window_bounds = array<i64: 1, 128, 32>}, {transform_indices = @transform_15, window_bounds = array<i64: 1, 1, 32>}, {pipeline_mode = #tpu.pipeline_mode<synchronous>, transform_indices = @transform_16, window_bounds = array<i64: 32, 128>}, {pipeline_mode = #tpu.pipeline_mode<synchronous>, transform_indices = @transform_17, window_bounds = array<i64: 1, 128>}, {pipeline_mode = #tpu.pipeline_mode<synchronous>, transform_indices = @transform_18, window_bounds = array<i64: 32, 128>}, {pipeline_mode = #tpu.pipeline_mode<synchronous>, transform_indices = @transform_19, window_bounds = array<i64: 2, 128>}]} {
    %c0_i32 = arith.constant 0 : i32
    %0 = arith.cmpi eq, %arg0, %c0_i32 : i32
    %1 = arith.extui %0 : i1 to i32
    %c0_i32_0 = arith.constant 0 : i32
    %2 = arith.cmpi ne, %1, %c0_i32_0 : i32
    scf.if %2 {
      %c0_75 = arith.constant 0 : index
      %c0_76 = arith.constant 0 : index
      %175 = vector.load %arg1[%c0_75, %c0_76] : memref<32x64xbf16, #tpu.memory_space<vmem>>, vector<32x64xbf16>
      %c0_77 = arith.constant 0 : index
      %c0_78 = arith.constant 0 : index
      %176 = vector.load %arg3[%c0_77, %c0_78] : memref<64x32xbf16, #tpu.memory_space<vmem>>, vector<64x32xbf16>
      %cst_79 = arith.constant dense<0.000000e+00> : vector<32x32xf32>
      %177 = tpu.matmul %175, %176, %cst_79 {dimension_numbers = #tpu.dot_dimension_numbers<[1], [0], [0], [1], [0, 0, 1, 1], [], []>} : vector<32x64xbf16>, vector<64x32xbf16>, vector<32x32xf32> -> vector<32x32xf32>
      %c0_80 = arith.constant 0 : index
      %c0_81 = arith.constant 0 : index
      %178 = vector.load %arg4[%c0_80, %c0_81] : memref<1x32xf32, #tpu.memory_space<vmem>>, vector<1x32xf32>
      %179 = vector.broadcast %178 : vector<1x32xf32> to vector<32x32xf32>
      %180 = arith.addf %177, %179 : vector<32x32xf32>
      %c0_82 = arith.constant 0 : index
      %c0_83 = arith.constant 0 : index
      %181 = vector.load %arg2[%c0_82, %c0_83] : memref<32x32xf32, #tpu.memory_space<vmem>>, vector<32x32xf32>
      %182 = arith.addf %180, %181 : vector<32x32xf32>
      %c0_84 = arith.constant 0 : index
      %c0_85 = arith.constant 0 : index
      %183 = vector.load %arg21[%c0_84, %c0_85] : memref<32x32xf32, #tpu.memory_space<vmem>>, vector<32x32xf32>
      tpu.vector_store %arg21[%c0_84, %c0_85], %182 {strides = array<i32>} : memref<32x32xf32, #tpu.memory_space<vmem>>, vector<32x32xf32>,
    } else {
    }
    %c0 = arith.constant 0 : index
    %c0_1 = arith.constant 0 : index
    %3 = vector.load %arg21[%c0, %c0_1] : memref<32x32xf32, #tpu.memory_space<vmem>>, vector<32x32xf32>
    %c0_2 = arith.constant 0 : index
    %c0_3 = arith.constant 0 : index
    %c0_4 = arith.constant 0 : index
    %4 = vector.load %arg5[%c0_2, %c0_3, %c0_4] : memref<1x1x32xf32, #tpu.memory_space<vmem>>, vector<1x1x32xf32>
    %5 = vector.shape_cast %4 : vector<1x1x32xf32> to vector<1x32xf32>
    %c0_5 = arith.constant 0 : index
    %c0_6 = arith.constant 0 : index
    %c0_7 = arith.constant 0 : index
    %6 = vector.load %arg6[%c0_5, %c0_6, %c0_7] : memref<1x1x32xf32, #tpu.memory_space<vmem>>, vector<1x1x32xf32>
    %7 = vector.shape_cast %6 : vector<1x1x32xf32> to vector<1x32xf32>
    %cst = arith.constant dense<0.000000e+00> : vector<32xf32>
    %8 = vector.multi_reduction <add>, %3, %cst [1] : vector<32x32xf32> to vector<32xf32>
    %9 = vector.shape_cast %8 : vector<32xf32> to vector<32x1xf32>
    %cst_8 = arith.constant 3.200000e+01 : f32
    %10 = vector.broadcast %cst_8 : f32 to vector<32x1xf32>
    %11 = arith.divf %9, %10 : vector<32x1xf32>
    %12 = vector.broadcast %11 : vector<32x1xf32> to vector<32x32xf32>
    %13 = arith.subf %3, %12 : vector<32x32xf32>
    %14 = arith.mulf %13, %13 : vector<32x32xf32>
    %cst_9 = arith.constant dense<0.000000e+00> : vector<32xf32>
    %15 = vector.multi_reduction <add>, %14, %cst_9 [1] : vector<32x32xf32> to vector<32xf32>
    %16 = vector.shape_cast %15 : vector<32xf32> to vector<32x1xf32>
    %cst_10 = arith.constant 3.200000e+01 : f32
    %17 = vector.broadcast %cst_10 : f32 to vector<32x1xf32>
    %18 = arith.divf %16, %17 : vector<32x1xf32>
    %cst_11 = arith.constant 9.99999974E-6 : f32
    %19 = vector.broadcast %cst_11 : f32 to vector<32x1xf32>
    %20 = arith.addf %18, %19 : vector<32x1xf32>
    %21 = math.rsqrt %20 : vector<32x1xf32>
    %22 = vector.broadcast %21 : vector<32x1xf32> to vector<32x32xf32>
    %23 = arith.mulf %13, %22 : vector<32x32xf32>
    %24 = vector.broadcast %5 : vector<1x32xf32> to vector<32x32xf32>
    %25 = arith.mulf %23, %24 : vector<32x32xf32>
    %26 = vector.broadcast %7 : vector<1x32xf32> to vector<32x32xf32>
    %27 = arith.addf %25, %26 : vector<32x32xf32>
    %28 = arith.truncf %27 : vector<32x32xf32> to vector<32x32xbf16>
    %c0_12 = arith.constant 0 : index
    %c0_13 = arith.constant 0 : index
    %c0_14 = arith.constant 0 : index
    %29 = vector.load %arg7[%c0_12, %c0_13, %c0_14] : memref<1x32x96xbf16, #tpu.memory_space<vmem>>, vector<1x32x96xbf16>
    %30 = vector.shape_cast %29 : vector<1x32x96xbf16> to vector<32x96xbf16>
    %cst_15 = arith.constant dense<0.000000e+00> : vector<32x96xf32>
    %31 = tpu.matmul %28, %30, %cst_15 {dimension_numbers = #tpu.dot_dimension_numbers<[1], [0], [0], [1], [0, 0, 1, 1], [], []>} : vector<32x32xbf16>, vector<32x96xbf16>, vector<32x96xf32> -> vector<32x96xf32>
    %c0_16 = arith.constant 0 : index
    %c0_17 = arith.constant 0 : index
    %c0_18 = arith.constant 0 : index
    %32 = vector.load %arg8[%c0_16, %c0_17, %c0_18] : memref<1x1x96xf32, #tpu.memory_space<vmem>>, vector<1x1x96xf32>
    %33 = vector.shape_cast %32 : vector<1x1x96xf32> to vector<1x96xf32>
    %34 = vector.broadcast %33 : vector<1x96xf32> to vector<32x96xf32>
    %35 = arith.addf %31, %34 : vector<32x96xf32>
    %36 = vector.shape_cast %35 : vector<32x96xf32> to vector<2x16x96xf32>
    %37 = vector.extract_strided_slice %36 {offsets = [0, 0, 0], sizes = [2, 16, 8], strides = [1, 1, 1]} : vector<2x16x96xf32> to vector<2x16x8xf32>
    %cst_19 = arith.constant 0.353553385 : f32
    %38 = vector.broadcast %cst_19 : f32 to vector<2x16x8xf32>
    %39 = arith.mulf %37, %38 : vector<2x16x8xf32>
    %40 = arith.truncf %39 : vector<2x16x8xf32> to vector<2x16x8xbf16>
    %41 = vector.extract_strided_slice %36 {offsets = [0, 0, 32], sizes = [2, 16, 8], strides = [1, 1, 1]} : vector<2x16x96xf32> to vector<2x16x8xf32>
    %42 = arith.truncf %41 : vector<2x16x8xf32> to vector<2x16x8xbf16>
    %43 = vector.extract_strided_slice %36 {offsets = [0, 0, 64], sizes = [2, 16, 8], strides = [1, 1, 1]} : vector<2x16x96xf32> to vector<2x16x8xf32>
    %44 = arith.truncf %43 : vector<2x16x8xf32> to vector<2x16x8xbf16>
    "tpu.trace_start"() <{level = 10 : i32, message = "bqd,bkd->bqk"}> : () -> ()
    %cst_20 = arith.constant dense<0.000000e+00> : vector<2x16x16xf32>
    %45 = tpu.matmul %40, %42, %cst_20 {dimension_numbers = #tpu.dot_dimension_numbers<[2], [2], [1], [1], [0, 0, 0, 1, 1, 1], [0], [0]>} : vector<2x16x8xbf16>, vector<2x16x8xbf16>, vector<2x16x16xf32> -> vector<2x16x16xf32>
    "tpu.trace_stop"() : () -> ()
    %cst_21 = arith.constant dense<0xFF800000> : vector<2x16xf32>
    %46 = vector.multi_reduction <maximumf>, %45, %cst_21 [2] : vector<2x16x16xf32> to vector<2x16xf32>
    %47 = vector.shape_cast %46 : vector<2x16xf32> to vector<2x16x1xf32>
    %48 = vector.broadcast %47 : vector<2x16x1xf32> to vector<2x16x16xf32>
    %49 = arith.subf %45, %48 : vector<2x16x16xf32>
    %50 = math.exp %49 : vector<2x16x16xf32>
    %cst_22 = arith.constant dense<0.000000e+00> : vector<2x16xf32>
    %51 = vector.multi_reduction <add>, %50, %cst_22 [2] : vector<2x16x16xf32> to vector<2x16xf32>
    %52 = vector.shape_cast %51 : vector<2x16xf32> to vector<2x16x1xf32>
    %53 = vector.broadcast %52 : vector<2x16x1xf32> to vector<2x16x16xf32>
    %54 = arith.divf %50, %53 : vector<2x16x16xf32>
    %55 = arith.truncf %54 : vector<2x16x16xf32> to vector<2x16x16xbf16>
    "tpu.trace_start"() <{level = 10 : i32, message = "bqk,bkd->bqd"}> : () -> ()
    %cst_23 = arith.constant dense<0.000000e+00> : vector<2x16x8xf32>
    %56 = tpu.matmul %55, %44, %cst_23 {dimension_numbers = #tpu.dot_dimension_numbers<[2], [1], [1], [2], [0, 0, 0, 1, 1, 2], [0], [0]>} : vector<2x16x16xbf16>, vector<2x16x8xbf16>, vector<2x16x8xf32> -> vector<2x16x8xf32>
    "tpu.trace_stop"() : () -> ()
    %57 = vector.extract_strided_slice %36 {offsets = [0, 0, 8], sizes = [2, 16, 8], strides = [1, 1, 1]} : vector<2x16x96xf32> to vector<2x16x8xf32>
    %cst_24 = arith.constant 0.353553385 : f32
    %58 = vector.broadcast %cst_24 : f32 to vector<2x16x8xf32>
    %59 = arith.mulf %57, %58 : vector<2x16x8xf32>
    %60 = arith.truncf %59 : vector<2x16x8xf32> to vector<2x16x8xbf16>
    %61 = vector.extract_strided_slice %36 {offsets = [0, 0, 40], sizes = [2, 16, 8], strides = [1, 1, 1]} : vector<2x16x96xf32> to vector<2x16x8xf32>
    %62 = arith.truncf %61 : vector<2x16x8xf32> to vector<2x16x8xbf16>
    %63 = vector.extract_strided_slice %36 {offsets = [0, 0, 72], sizes = [2, 16, 8], strides = [1, 1, 1]} : vector<2x16x96xf32> to vector<2x16x8xf32>
    %64 = arith.truncf %63 : vector<2x16x8xf32> to vector<2x16x8xbf16>
    "tpu.trace_start"() <{level = 10 : i32, message = "bqd,bkd->bqk"}> : () -> ()
    %cst_25 = arith.constant dense<0.000000e+00> : vector<2x16x16xf32>
    %65 = tpu.matmul %60, %62, %cst_25 {dimension_numbers = #tpu.dot_dimension_numbers<[2], [2], [1], [1], [0, 0, 0, 1, 1, 1], [0], [0]>} : vector<2x16x8xbf16>, vector<2x16x8xbf16>, vector<2x16x16xf32> -> vector<2x16x16xf32>
    "tpu.trace_stop"() : () -> ()
    %cst_26 = arith.constant dense<0xFF800000> : vector<2x16xf32>
    %66 = vector.multi_reduction <maximumf>, %65, %cst_26 [2] : vector<2x16x16xf32> to vector<2x16xf32>
    %67 = vector.shape_cast %66 : vector<2x16xf32> to vector<2x16x1xf32>
    %68 = vector.broadcast %67 : vector<2x16x1xf32> to vector<2x16x16xf32>
    %69 = arith.subf %65, %68 : vector<2x16x16xf32>
    %70 = math.exp %69 : vector<2x16x16xf32>
    %cst_27 = arith.constant dense<0.000000e+00> : vector<2x16xf32>
    %71 = vector.multi_reduction <add>, %70, %cst_27 [2] : vector<2x16x16xf32> to vector<2x16xf32>
    %72 = vector.shape_cast %71 : vector<2x16xf32> to vector<2x16x1xf32>
    %73 = vector.broadcast %72 : vector<2x16x1xf32> to vector<2x16x16xf32>
    %74 = arith.divf %70, %73 : vector<2x16x16xf32>
    %75 = arith.truncf %74 : vector<2x16x16xf32> to vector<2x16x16xbf16>
    "tpu.trace_start"() <{level = 10 : i32, message = "bqk,bkd->bqd"}> : () -> ()
    %cst_28 = arith.constant dense<0.000000e+00> : vector<2x16x8xf32>
    %76 = tpu.matmul %75, %64, %cst_28 {dimension_numbers = #tpu.dot_dimension_numbers<[2], [1], [1], [2], [0, 0, 0, 1, 1, 2], [0], [0]>} : vector<2x16x16xbf16>, vector<2x16x8xbf16>, vector<2x16x8xf32> -> vector<2x16x8xf32>
    "tpu.trace_stop"() : () -> ()
    %77 = vector.extract_strided_slice %36 {offsets = [0, 0, 16], sizes = [2, 16, 8], strides = [1, 1, 1]} : vector<2x16x96xf32> to vector<2x16x8xf32>
    %cst_29 = arith.constant 0.353553385 : f32
    %78 = vector.broadcast %cst_29 : f32 to vector<2x16x8xf32>
    %79 = arith.mulf %77, %78 : vector<2x16x8xf32>
    %80 = arith.truncf %79 : vector<2x16x8xf32> to vector<2x16x8xbf16>
    %81 = vector.extract_strided_slice %36 {offsets = [0, 0, 48], sizes = [2, 16, 8], strides = [1, 1, 1]} : vector<2x16x96xf32> to vector<2x16x8xf32>
    %82 = arith.truncf %81 : vector<2x16x8xf32> to vector<2x16x8xbf16>
    %83 = vector.extract_strided_slice %36 {offsets = [0, 0, 80], sizes = [2, 16, 8], strides = [1, 1, 1]} : vector<2x16x96xf32> to vector<2x16x8xf32>
    %84 = arith.truncf %83 : vector<2x16x8xf32> to vector<2x16x8xbf16>
    "tpu.trace_start"() <{level = 10 : i32, message = "bqd,bkd->bqk"}> : () -> ()
    %cst_30 = arith.constant dense<0.000000e+00> : vector<2x16x16xf32>
    %85 = tpu.matmul %80, %82, %cst_30 {dimension_numbers = #tpu.dot_dimension_numbers<[2], [2], [1], [1], [0, 0, 0, 1, 1, 1], [0], [0]>} : vector<2x16x8xbf16>, vector<2x16x8xbf16>, vector<2x16x16xf32> -> vector<2x16x16xf32>
    "tpu.trace_stop"() : () -> ()
    %cst_31 = arith.constant dense<0xFF800000> : vector<2x16xf32>
    %86 = vector.multi_reduction <maximumf>, %85, %cst_31 [2] : vector<2x16x16xf32> to vector<2x16xf32>
    %87 = vector.shape_cast %86 : vector<2x16xf32> to vector<2x16x1xf32>
    %88 = vector.broadcast %87 : vector<2x16x1xf32> to vector<2x16x16xf32>
    %89 = arith.subf %85, %88 : vector<2x16x16xf32>
    %90 = math.exp %89 : vector<2x16x16xf32>
    %cst_32 = arith.constant dense<0.000000e+00> : vector<2x16xf32>
    %91 = vector.multi_reduction <add>, %90, %cst_32 [2] : vector<2x16x16xf32> to vector<2x16xf32>
    %92 = vector.shape_cast %91 : vector<2x16xf32> to vector<2x16x1xf32>
    %93 = vector.broadcast %92 : vector<2x16x1xf32> to vector<2x16x16xf32>
    %94 = arith.divf %90, %93 : vector<2x16x16xf32>
    %95 = arith.truncf %94 : vector<2x16x16xf32> to vector<2x16x16xbf16>
    "tpu.trace_start"() <{level = 10 : i32, message = "bqk,bkd->bqd"}> : () -> ()
    %cst_33 = arith.constant dense<0.000000e+00> : vector<2x16x8xf32>
    %96 = tpu.matmul %95, %84, %cst_33 {dimension_numbers = #tpu.dot_dimension_numbers<[2], [1], [1], [2], [0, 0, 0, 1, 1, 2], [0], [0]>} : vector<2x16x16xbf16>, vector<2x16x8xbf16>, vector<2x16x8xf32> -> vector<2x16x8xf32>
    "tpu.trace_stop"() : () -> ()
    %97 = vector.extract_strided_slice %36 {offsets = [0, 0, 24], sizes = [2, 16, 8], strides = [1, 1, 1]} : vector<2x16x96xf32> to vector<2x16x8xf32>
    %cst_34 = arith.constant 0.353553385 : f32
    %98 = vector.broadcast %cst_34 : f32 to vector<2x16x8xf32>
    %99 = arith.mulf %97, %98 : vector<2x16x8xf32>
    %100 = arith.truncf %99 : vector<2x16x8xf32> to vector<2x16x8xbf16>
    %101 = vector.extract_strided_slice %36 {offsets = [0, 0, 56], sizes = [2, 16, 8], strides = [1, 1, 1]} : vector<2x16x96xf32> to vector<2x16x8xf32>
    %102 = arith.truncf %101 : vector<2x16x8xf32> to vector<2x16x8xbf16>
    %103 = vector.extract_strided_slice %36 {offsets = [0, 0, 88], sizes = [2, 16, 8], strides = [1, 1, 1]} : vector<2x16x96xf32> to vector<2x16x8xf32>
    %104 = arith.truncf %103 : vector<2x16x8xf32> to vector<2x16x8xbf16>
    "tpu.trace_start"() <{level = 10 : i32, message = "bqd,bkd->bqk"}> : () -> ()
    %cst_35 = arith.constant dense<0.000000e+00> : vector<2x16x16xf32>
    %105 = tpu.matmul %100, %102, %cst_35 {dimension_numbers = #tpu.dot_dimension_numbers<[2], [2], [1], [1], [0, 0, 0, 1, 1, 1], [0], [0]>} : vector<2x16x8xbf16>, vector<2x16x8xbf16>, vector<2x16x16xf32> -> vector<2x16x16xf32>
    "tpu.trace_stop"() : () -> ()
    %cst_36 = arith.constant dense<0xFF800000> : vector<2x16xf32>
    %106 = vector.multi_reduction <maximumf>, %105, %cst_36 [2] : vector<2x16x16xf32> to vector<2x16xf32>
    %107 = vector.shape_cast %106 : vector<2x16xf32> to vector<2x16x1xf32>
    %108 = vector.broadcast %107 : vector<2x16x1xf32> to vector<2x16x16xf32>
    %109 = arith.subf %105, %108 : vector<2x16x16xf32>
    %110 = math.exp %109 : vector<2x16x16xf32>
    %cst_37 = arith.constant dense<0.000000e+00> : vector<2x16xf32>
    %111 = vector.multi_reduction <add>, %110, %cst_37 [2] : vector<2x16x16xf32> to vector<2x16xf32>
    %112 = vector.shape_cast %111 : vector<2x16xf32> to vector<2x16x1xf32>
    %113 = vector.broadcast %112 : vector<2x16x1xf32> to vector<2x16x16xf32>
    %114 = arith.divf %110, %113 : vector<2x16x16xf32>
    %115 = arith.truncf %114 : vector<2x16x16xf32> to vector<2x16x16xbf16>
    "tpu.trace_start"() <{level = 10 : i32, message = "bqk,bkd->bqd"}> : () -> ()
    %cst_38 = arith.constant dense<0.000000e+00> : vector<2x16x8xf32>
    %116 = tpu.matmul %115, %104, %cst_38 {dimension_numbers = #tpu.dot_dimension_numbers<[2], [1], [1], [2], [0, 0, 0, 1, 1, 2], [0], [0]>} : vector<2x16x16xbf16>, vector<2x16x8xbf16>, vector<2x16x8xf32> -> vector<2x16x8xf32>
    "tpu.trace_stop"() : () -> ()
    %117 = tpu.concatenate %56, %76, %96, %116 in 2 : vector<2x16x8xf32>, vector<2x16x8xf32>, vector<2x16x8xf32>, vector<2x16x8xf32> -> vector<2x16x32xf32>
    %118 = vector.shape_cast %117 : vector<2x16x32xf32> to vector<32x32xf32>
    %119 = arith.truncf %118 : vector<32x32xf32> to vector<32x32xbf16>
    %c0_39 = arith.constant 0 : index
    %c0_40 = arith.constant 0 : index
    %c0_41 = arith.constant 0 : index
    %120 = vector.load %arg9[%c0_39, %c0_40, %c0_41] : memref<1x32x32xbf16, #tpu.memory_space<vmem>>, vector<1x32x32xbf16>
    %121 = vector.shape_cast %120 : vector<1x32x32xbf16> to vector<32x32xbf16>
    %cst_42 = arith.constant dense<0.000000e+00> : vector<32x32xf32>
    %122 = tpu.matmul %119, %121, %cst_42 {dimension_numbers = #tpu.dot_dimension_numbers<[1], [0], [0], [1], [0, 0, 1, 1], [], []>} : vector<32x32xbf16>, vector<32x32xbf16>, vector<32x32xf32> -> vector<32x32xf32>
    %123 = arith.addf %3, %122 : vector<32x32xf32>
    %c0_43 = arith.constant 0 : index
    %c0_44 = arith.constant 0 : index
    %c0_45 = arith.constant 0 : index
    %124 = vector.load %arg10[%c0_43, %c0_44, %c0_45] : memref<1x1x32xf32, #tpu.memory_space<vmem>>, vector<1x1x32xf32>
    %125 = vector.shape_cast %124 : vector<1x1x32xf32> to vector<1x32xf32>
    %126 = vector.broadcast %125 : vector<1x32xf32> to vector<32x32xf32>
    %127 = arith.addf %123, %126 : vector<32x32xf32>
    %c0_46 = arith.constant 0 : index
    %c0_47 = arith.constant 0 : index
    %c0_48 = arith.constant 0 : index
    %128 = vector.load %arg11[%c0_46, %c0_47, %c0_48] : memref<1x1x32xf32, #tpu.memory_space<vmem>>, vector<1x1x32xf32>
    %129 = vector.shape_cast %128 : vector<1x1x32xf32> to vector<1x32xf32>
    %c0_49 = arith.constant 0 : index
    %c0_50 = arith.constant 0 : index
    %c0_51 = arith.constant 0 : index
    %130 = vector.load %arg12[%c0_49, %c0_50, %c0_51] : memref<1x1x32xf32, #tpu.memory_space<vmem>>, vector<1x1x32xf32>
    %131 = vector.shape_cast %130 : vector<1x1x32xf32> to vector<1x32xf32>
    %cst_52 = arith.constant dense<0.000000e+00> : vector<32xf32>
    %132 = vector.multi_reduction <add>, %127, %cst_52 [1] : vector<32x32xf32> to vector<32xf32>
    %133 = vector.shape_cast %132 : vector<32xf32> to vector<32x1xf32>
    %cst_53 = arith.constant 3.200000e+01 : f32
    %134 = vector.broadcast %cst_53 : f32 to vector<32x1xf32>
    %135 = arith.divf %133, %134 : vector<32x1xf32>
    %136 = vector.broadcast %135 : vector<32x1xf32> to vector<32x32xf32>
    %137 = arith.subf %127, %136 : vector<32x32xf32>
    %138 = arith.mulf %137, %137 : vector<32x32xf32>
    %cst_54 = arith.constant dense<0.000000e+00> : vector<32xf32>
    %139 = vector.multi_reduction <add>, %138, %cst_54 [1] : vector<32x32xf32> to vector<32xf32>
    %140 = vector.shape_cast %139 : vector<32xf32> to vector<32x1xf32>
    %cst_55 = arith.constant 3.200000e+01 : f32
    %141 = vector.broadcast %cst_55 : f32 to vector<32x1xf32>
    %142 = arith.divf %140, %141 : vector<32x1xf32>
    %cst_56 = arith.constant 9.99999974E-6 : f32
    %143 = vector.broadcast %cst_56 : f32 to vector<32x1xf32>
    %144 = arith.addf %142, %143 : vector<32x1xf32>
    %145 = math.rsqrt %144 : vector<32x1xf32>
    %146 = vector.broadcast %145 : vector<32x1xf32> to vector<32x32xf32>
    %147 = arith.mulf %137, %146 : vector<32x32xf32>
    %148 = vector.broadcast %129 : vector<1x32xf32> to vector<32x32xf32>
    %149 = arith.mulf %147, %148 : vector<32x32xf32>
    %150 = vector.broadcast %131 : vector<1x32xf32> to vector<32x32xf32>
    %151 = arith.addf %149, %150 : vector<32x32xf32>
    %152 = arith.truncf %151 : vector<32x32xf32> to vector<32x32xbf16>
    %c0_57 = arith.constant 0 : index
    %c0_58 = arith.constant 0 : index
    %c0_59 = arith.constant 0 : index
    %153 = vector.load %arg13[%c0_57, %c0_58, %c0_59] : memref<1x32x128xbf16, #tpu.memory_space<vmem>>, vector<1x32x128xbf16>
    %154 = vector.shape_cast %153 : vector<1x32x128xbf16> to vector<32x128xbf16>
    %cst_60 = arith.constant dense<0.000000e+00> : vector<32x128xf32>
    %155 = tpu.matmul %152, %154, %cst_60 {dimension_numbers = #tpu.dot_dimension_numbers<[1], [0], [0], [1], [0, 0, 1, 1], [], []>} : vector<32x32xbf16>, vector<32x128xbf16>, vector<32x128xf32> -> vector<32x128xf32>
    %c0_61 = arith.constant 0 : index
    %c0_62 = arith.constant 0 : index
    %c0_63 = arith.constant 0 : index
    %156 = vector.load %arg14[%c0_61, %c0_62, %c0_63] : memref<1x1x128xf32, #tpu.memory_space<vmem>>, vector<1x1x128xf32>
    %157 = vector.shape_cast %156 : vector<1x1x128xf32> to vector<1x128xf32>
    %158 = vector.broadcast %157 : vector<1x128xf32> to vector<32x128xf32>
    %159 = arith.addf %155, %158 : vector<32x128xf32>
    %cst_64 = arith.constant 0.000000e+00 : f32
    %160 = vector.broadcast %cst_64 : f32 to vector<32x128xf32>
    %161 = arith.maximumf %159, %160 : vector<32x128xf32>
    %162 = arith.truncf %161 : vector<32x128xf32> to vector<32x128xbf16>
    %c0_65 = arith.constant 0 : index
    %c0_66 = arith.constant 0 : index
    %c0_67 = arith.constant 0 : index
    %163 = vector.load %arg15[%c0_65, %c0_66, %c0_67] : memref<1x128x32xbf16, #tpu.memory_space<vmem>>, vector<1x128x32xbf16>
    %164 = vector.shape_cast %163 : vector<1x128x32xbf16> to vector<128x32xbf16>
    %cst_68 = arith.constant dense<0.000000e+00> : vector<32x32xf32>
    %165 = tpu.matmul %162, %164, %cst_68 {dimension_numbers = #tpu.dot_dimension_numbers<[1], [0], [0], [1], [0, 0, 1, 1], [], []>} : vector<32x128xbf16>, vector<128x32xbf16>, vector<32x32xf32> -> vector<32x32xf32>
    %166 = arith.addf %127, %165 : vector<32x32xf32>
    %c0_69 = arith.constant 0 : index
    %c0_70 = arith.constant 0 : index
    %c0_71 = arith.constant 0 : index
    %167 = vector.load %arg16[%c0_69, %c0_70, %c0_71] : memref<1x1x32xf32, #tpu.memory_space<vmem>>, vector<1x1x32xf32>
    %168 = vector.shape_cast %167 : vector<1x1x32xf32> to vector<1x32xf32>
    %169 = vector.broadcast %168 : vector<1x32xf32> to vector<32x32xf32>
    %170 = arith.addf %166, %169 : vector<32x32xf32>
    %c0_72 = arith.constant 0 : index
    %c0_73 = arith.constant 0 : index
    %171 = vector.load %arg21[%c0_72, %c0_73] : memref<32x32xf32, #tpu.memory_space<vmem>>, vector<32x32xf32>
    tpu.vector_store %arg21[%c0_72, %c0_73], %170 {strides = array<i32>} : memref<32x32xf32, #tpu.memory_space<vmem>>, vector<32x32xf32>,
    %c1_i32 = arith.constant 1 : i32
    %172 = arith.cmpi eq, %arg0, %c1_i32 : i32
    %173 = arith.extui %172 : i1 to i32
    %c0_i32_74 = arith.constant 0 : i32
    %174 = arith.cmpi ne, %173, %c0_i32_74 : i32
    scf.if %174 {
      %175 = arith.truncf %170 : vector<32x32xf32> to vector<32x32xbf16>
      %c0_75 = arith.constant 0 : index
      %c0_76 = arith.constant 0 : index
      %176 = vector.load %arg17[%c0_75, %c0_76] : memref<32x128xbf16, #tpu.memory_space<vmem>>, vector<32x128xbf16>
      %cst_77 = arith.constant dense<0.000000e+00> : vector<32x128xf32>
      %177 = tpu.matmul %175, %176, %cst_77 {dimension_numbers = #tpu.dot_dimension_numbers<[1], [0], [0], [1], [0, 0, 1, 1], [], []>} : vector<32x32xbf16>, vector<32x128xbf16>, vector<32x128xf32> -> vector<32x128xf32>
      %c0_78 = arith.constant 0 : index
      %c0_79 = arith.constant 0 : index
      %178 = vector.load %arg18[%c0_78, %c0_79] : memref<1x128xf32, #tpu.memory_space<vmem>>, vector<1x128xf32>
      %179 = vector.broadcast %178 : vector<1x128xf32> to vector<32x128xf32>
      %180 = arith.addf %177, %179 : vector<32x128xf32>
      %c0_80 = arith.constant 0 : index
      %c0_81 = arith.constant 0 : index
      %181 = vector.load %arg19[%c0_80, %c0_81] : memref<32x128xf32, #tpu.memory_space<vmem>>, vector<32x128xf32>
      tpu.vector_store %arg19[%c0_80, %c0_81], %180 {strides = array<i32>} : memref<32x128xf32, #tpu.memory_space<vmem>>, vector<32x128xf32>,
      %cst_82 = arith.constant 0.000000e+00 : f32
      %182 = vector.broadcast %cst_82 : f32 to vector<2x16xf32>
      %cst_83 = arith.constant dense<0.000000e+00> : vector<2x16xf32>
      %183 = vector.multi_reduction <add>, %54, %cst_83 [1] : vector<2x16x16xf32> to vector<2x16xf32>
      %184 = arith.addf %182, %183 : vector<2x16xf32>
      %cst_84 = arith.constant dense<0.000000e+00> : vector<2x16xf32>
      %185 = vector.multi_reduction <add>, %74, %cst_84 [1] : vector<2x16x16xf32> to vector<2x16xf32>
      %186 = arith.addf %184, %185 : vector<2x16xf32>
      %cst_85 = arith.constant dense<0.000000e+00> : vector<2x16xf32>
      %187 = vector.multi_reduction <add>, %94, %cst_85 [1] : vector<2x16x16xf32> to vector<2x16xf32>
      %188 = arith.addf %186, %187 : vector<2x16xf32>
      %cst_86 = arith.constant dense<0.000000e+00> : vector<2x16xf32>
      %189 = vector.multi_reduction <add>, %114, %cst_86 [1] : vector<2x16x16xf32> to vector<2x16xf32>
      %190 = arith.addf %188, %189 : vector<2x16xf32>
      %cst_87 = arith.constant 1.562500e-02 : f32
      %191 = vector.broadcast %cst_87 : f32 to vector<2x16xf32>
      %192 = arith.mulf %190, %191 : vector<2x16xf32>
      %cst_88 = arith.constant 0.000000e+00 : f32
      %193 = vector.broadcast %cst_88 : f32 to vector<2x112xf32>
      %194 = tpu.concatenate %192, %193 in 1 : vector<2x16xf32>, vector<2x112xf32> -> vector<2x128xf32>
      %c0_89 = arith.constant 0 : index
      %c0_90 = arith.constant 0 : index
      %195 = vector.load %arg20[%c0_89, %c0_90] : memref<2x128xf32, #tpu.memory_space<vmem>>, vector<2x128xf32>
      tpu.vector_store %arg20[%c0_89, %c0_90], %194 {strides = array<i32>} : memref<2x128xf32, #tpu.memory_space<vmem>>, vector<2x128xf32>,
    } else {
    }
    return
  }
  func.func @transform_0(%arg0: i32) -> (i32, i32) {
    %c0_i32 = arith.constant 0 : i32
    %c0_i32_0 = arith.constant 0 : i32
    %c0_i32_1 = arith.constant 0 : i32
    return %c0_i32, %c0_i32_0 : i32, i32
  }
  func.func @transform_1(%arg0: i32) -> (i32, i32) {
    %c0_i32 = arith.constant 0 : i32
    %c0_i32_0 = arith.constant 0 : i32
    %c0_i32_1 = arith.constant 0 : i32
    return %c0_i32, %c0_i32_0 : i32, i32
  }
  func.func @transform_2(%arg0: i32) -> (i32, i32) {
    %c0_i32 = arith.constant 0 : i32
    %c0_i32_0 = arith.constant 0 : i32
    %c0_i32_1 = arith.constant 0 : i32
    return %c0_i32, %c0_i32_0 : i32, i32
  }
  func.func @transform_3(%arg0: i32) -> (i32, i32) {
    %c0_i32 = arith.constant 0 : i32
    %c0_i32_0 = arith.constant 0 : i32
    %c0_i32_1 = arith.constant 0 : i32
    return %c0_i32, %c0_i32_0 : i32, i32
  }
  func.func @transform_4(%arg0: i32) -> (i32, i32, i32) {
    %c0_i32 = arith.constant 0 : i32
    %c0_i32_0 = arith.constant 0 : i32
    %c0_i32_1 = arith.constant 0 : i32
    return %arg0, %c0_i32, %c0_i32_0 : i32, i32, i32
  }
  func.func @transform_5(%arg0: i32) -> (i32, i32, i32) {
    %c0_i32 = arith.constant 0 : i32
    %c0_i32_0 = arith.constant 0 : i32
    %c0_i32_1 = arith.constant 0 : i32
    return %arg0, %c0_i32, %c0_i32_0 : i32, i32, i32
  }
  func.func @transform_6(%arg0: i32) -> (i32, i32, i32) {
    %c0_i32 = arith.constant 0 : i32
    %c0_i32_0 = arith.constant 0 : i32
    %c0_i32_1 = arith.constant 0 : i32
    return %arg0, %c0_i32, %c0_i32_0 : i32, i32, i32
  }
  func.func @transform_7(%arg0: i32) -> (i32, i32, i32) {
    %c0_i32 = arith.constant 0 : i32
    %c0_i32_0 = arith.constant 0 : i32
    %c0_i32_1 = arith.constant 0 : i32
    return %arg0, %c0_i32, %c0_i32_0 : i32, i32, i32
  }
  func.func @transform_8(%arg0: i32) -> (i32, i32, i32) {
    %c0_i32 = arith.constant 0 : i32
    %c0_i32_0 = arith.constant 0 : i32
    %c0_i32_1 = arith.constant 0 : i32
    return %arg0, %c0_i32, %c0_i32_0 : i32, i32, i32
  }
  func.func @transform_9(%arg0: i32) -> (i32, i32, i32) {
    %c0_i32 = arith.constant 0 : i32
    %c0_i32_0 = arith.constant 0 : i32
    %c0_i32_1 = arith.constant 0 : i32
    return %arg0, %c0_i32, %c0_i32_0 : i32, i32, i32
  }
  func.func @transform_10(%arg0: i32) -> (i32, i32, i32) {
    %c0_i32 = arith.constant 0 : i32
    %c0_i32_0 = arith.constant 0 : i32
    %c0_i32_1 = arith.constant 0 : i32
    return %arg0, %c0_i32, %c0_i32_0 : i32, i32, i32
  }
  func.func @transform_11(%arg0: i32) -> (i32, i32, i32) {
    %c0_i32 = arith.constant 0 : i32
    %c0_i32_0 = arith.constant 0 : i32
    %c0_i32_1 = arith.constant 0 : i32
    return %arg0, %c0_i32, %c0_i32_0 : i32, i32, i32
  }
  func.func @transform_12(%arg0: i32) -> (i32, i32, i32) {
    %c0_i32 = arith.constant 0 : i32
    %c0_i32_0 = arith.constant 0 : i32
    %c0_i32_1 = arith.constant 0 : i32
    return %arg0, %c0_i32, %c0_i32_0 : i32, i32, i32
  }
  func.func @transform_13(%arg0: i32) -> (i32, i32, i32) {
    %c0_i32 = arith.constant 0 : i32
    %c0_i32_0 = arith.constant 0 : i32
    %c0_i32_1 = arith.constant 0 : i32
    return %arg0, %c0_i32, %c0_i32_0 : i32, i32, i32
  }
  func.func @transform_14(%arg0: i32) -> (i32, i32, i32) {
    %c0_i32 = arith.constant 0 : i32
    %c0_i32_0 = arith.constant 0 : i32
    %c0_i32_1 = arith.constant 0 : i32
    return %arg0, %c0_i32, %c0_i32_0 : i32, i32, i32
  }
  func.func @transform_15(%arg0: i32) -> (i32, i32, i32) {
    %c0_i32 = arith.constant 0 : i32
    %c0_i32_0 = arith.constant 0 : i32
    %c0_i32_1 = arith.constant 0 : i32
    return %arg0, %c0_i32, %c0_i32_0 : i32, i32, i32
  }
  func.func @transform_16(%arg0: i32) -> (i32, i32) {
    %c0_i32 = arith.constant 0 : i32
    %c0_i32_0 = arith.constant 0 : i32
    %c0_i32_1 = arith.constant 0 : i32
    return %c0_i32, %c0_i32_0 : i32, i32
  }
  func.func @transform_17(%arg0: i32) -> (i32, i32) {
    %c0_i32 = arith.constant 0 : i32
    %c0_i32_0 = arith.constant 0 : i32
    %c0_i32_1 = arith.constant 0 : i32
    return %c0_i32, %c0_i32_0 : i32, i32
  }
  func.func @transform_18(%arg0: i32) -> (i32, i32) {
    %c0_i32 = arith.constant 0 : i32
    %c0_i32_0 = arith.constant 0 : i32
    %c0_i32_1 = arith.constant 0 : i32
    return %c0_i32, %c0_i32_0 : i32, i32
  }
  func.func @transform_19(%arg0: i32) -> (i32, i32) {
    %c0_i32 = arith.constant 0 : i32
    %c0_i32_0 = arith.constant 0 : i32
    %c0_i32_1 = arith.constant 0 : i32
    return %c0_i32, %c0_i32_0 : i32, i32
  }
}

</mosaic_0001>

<bundles_post_ra>
// kernel: vit_block_forward.1
= control target key start
LH: loop header
LB: loop body
LE: loop exit
PB: predicated region body
PF: predicated region fallthrough
CT: control target
= control target key end

     0   :  { %s3870_s0 = inlined_call_operand.vmem [shape: bf16[32,64], index: 0, kind: input, shape index: {}]   ;;  %s3871_s1 = inlined_call_operand.vmem [shape: f32[32,32], index: 1, kind: input, shape index: {}]   ;;  %s3872_s2 = inlined_call_operand.vmem [shape: bf16[64,32], index: 2, kind: input, shape index: {}]   ;;  %s3873_s3 = inlined_call_operand.vmem [shape: f32[1,32], index: 3, kind: input, shape index: {}]   ;;  %s3874_s4 = inlined_call_operand.vmem [shape: f32[2,1,32], index: 4, kind: input, shape index: {}]   ;;  %s3875_s5 = inlined_call_operand.vmem [shape: f32[2,1,32], index: 5, kind: input, shape index: {}]   ;;  %s3876_s6 = inlined_call_operand.vmem [shape: bf16[2,32,96], index: 6, kind: input, shape index: {}]   ;;  %s3877_s7 = inlined_call_operand.vmem [shape: f32[2,1,96], index: 7, kind: input, shape index: {}]   ;;  %s3878_s8 = inlined_call_operand.vmem [shape: bf16[2,32,32], index: 8, kind: input, shape index: {}]   ;;  %s3879_s9 = inlined_call_operand.vmem [shape: f32[2,1,32], index: 9, kind: input, shape index: {}]   ;;  %s3880_s10 = inlined_call_operand.vmem [shape: f32[2,1,32], index: 10, kind: input, shape index: {}]   ;;  %s3881_s11 = inlined_call_operand.vmem [shape: f32[2,1,32], index: 11, kind: input, shape index: {}]   ;;  %s3882_s12 = inlined_call_operand.vmem [shape: bf16[2,32,128], index: 12, kind: input, shape index: {}]   ;;  %s3883_s13 = inlined_call_operand.vmem [shape: f32[2,1,128], index: 13, kind: input, shape index: {}]   ;;  %s3884_s14 = inlined_call_operand.vmem [shape: bf16[2,128,32], index: 14, kind: input, shape index: {}]   ;;  %s3885_s15 = inlined_call_operand.vmem [shape: f32[2,1,32], index: 15, kind: input, shape index: {}]   ;;  %s3886_s16 = inlined_call_operand.vmem [shape: bf16[32,128], index: 16, kind: input, shape index: {}]   ;;  %s3887_s17 = inlined_call_operand.vmem [shape: f32[1,128], index: 17, kind: input, shape index: {}]   ;;  %s3888_s18 = inlined_call_operand.vmem [shape: f32[32,128], index: 18, kind: output, shape index: {0}]   ;;  %s3889_s19 = inlined_call_operand.vmem [shape: f32[2,128], index: 19, kind: output, shape index: {1}]  }
   0x1   :  { %3896 = sst [smem:[#allocation4_spill]] %s3870_s0  ;;  %s3369_s0 = smov 0  }
   0x2   :  { %3897 = sst [smem:[#allocation5_spill]] %s3871_s1 }
   0x3   :  { %3898 = sst [smem:[#allocation6_spill]] %s3872_s2 }
   0x4   :  { %3899 = sst [smem:[#allocation7_spill]] %s3873_s3 }
   0x5   :  { %3900 = sst [smem:[#allocation8_spill]] %s3876_s6 }
   0x6   :  { %3901 = sst [smem:[#allocation9_spill]] %s3878_s8 }
   0x7   :  { %3902 = sst [smem:[#allocation10_spill]] %s3886_s16 }
   0x8   :  { %3903 = sst [smem:[#allocation11_spill]] %s3887_s17 }
   0x9   :  { %3904 = sst [smem:[#allocation12_spill]] %s3888_s18 }
   0xa   :  { %3905 = sst [smem:[#allocation13_spill]] %s3889_s19 }
   0xb LB: > { %3906 = sst [smem:[#allocation3_spill]] %s3251_s0  ;;  %s3375_s30 = sadd.s32 4294967295, %s3251_s0   ;;  %s3251_s0 = sphi %s3369_s0, %s30_s0  }
   0xc   : > { %p2786_p0 = scmp.ge.s32.totalorder %s3251_s0, 1  ;;  %p624_p1 = scmp.lt.s32.totalorder %s3251_s0, 3 }
   0xe   : > { %p625_p2 = pnand %p2786_p0, %p624_p1 }
   0xf   : > { %p714_p3 = scmp.lt.s32.totalorder (!%p625_p2), %s3375_s30, 1  ;;  %s3907_s6 = sld [smem:[#allocation8_spill]] (!%p625_p2) }
  0x10   : > { %628 = sbr.rel (%p625_p2) target bundleno = 4730 (0x127a), region = 92  ;;  %s3908_s8 = sld [smem:[#allocation9_spill]] (!%p625_p2) }
  0x11   : > { %p2795_p4 = scmp.ne.s32.totalorder (!%p625_p2), %s3375_s30, 0 }
  0x17   : > { %s3381_s20 = scalar_select %p714_p3, %s3375_s30, 1 }
  0x18   : > { %762 = sbr.rel (%p2795_p4) target bundleno = 267 (0x10b), region = 96  ;;  %s3909_s28 = sld [smem:[#allocation6_spill]] (!%p2795_p4)  ;;  %vm816_vm0 = vcmask (!%p2795_p4), 523264   ;;  %vm880_vm1 = vcmask (!%p2795_p4), 261120  }
  0x19   : > { %s2857_s25 = sshll.u32 %s3381_s20, 4  ;;  %s738_s19 = scalar_lea.vmem %s3880_s10, %s3381_s20 }
  0x1a   : > { %s3399_s21 = scalar_lea.vmem %s3907_s6, %s2857_s25  ;;  %s3404_s18 = scalar_lea.vmem %s3908_s8, %s2857_s25 }
  0x1b   : > { %s741_s27 = scalar_lea.vmem %s3881_s11, %s3381_s20  ;;  %s3421_s6 = scalar_lea.vmem %s3882_s12, %s2857_s25 }
  0x1c   : > { %s749_s8 = scalar_lea.vmem %s3883_s13, %s3381_s20  ;;  %s2860_s16 = sshll.u32 %s3381_s20, 6 }
  0x1d   : > { %s3431_s2 = scalar_lea.vmem %s3884_s14, %s2860_s16  ;;  %s3910_s24 = sld [smem:[#allocation4_spill]] (!%p2795_p4) }
  0x1e   : > { %v3109_v0 = vld [vmem:[%s3909_s28] sm:$0xff] (!%p2795_p4)   ;;  %v3110_v1 = vld [vmem:[%s3909_s28 + $0x8] sm:$0xff] (!%p2795_p4)   ;;  %v3111_v2 = vld [vmem:[%s3909_s28 + $0x10] sm:$0xff] (!%p2795_p4)   ;;  %s3911_s16 = sld [smem:[#allocation7_spill]] (!%p2795_p4)  ;;  %s3912_s3 = sld [smem:[#allocation5_spill]] (!%p2795_p4) }
  0x1f   : > { %2925 = vmatprep.subr.bf16.mxu0 %v3109_v0  ;;  %v3112_v4 = vld [vmem:[%s3909_s28 + $0x18] sm:$0xff]  }
  0x20   : > { %2926 = vmatpush3.bf16.msra.mxu0 %v3109_v0 }
  0x21   : > { %2927 = vmatprep.subr.bf16.mxu0 %v3110_v1 }
  0x23   : > { %v3113_v3 = vld [vmem:[%s3910_s24] sm:$0xff]   ;;  %v3114_v5 = vld [vmem:[%s3910_s24 + $0x8] sm:$0xff]  }
  0x24   : > { %2933 = vmatprep.mubr.msk.bf16.mxu0 %vm816_vm0, %v3113_v3  ;;  %2928 = vmatpush3.bf16.msra.mxu0 %v3110_v1  ;;  %v2796_v6 = vld [vmem:[%s3911_s16] ss:$0 sm:$0xff]  ;;  %v874_v8 = vld [vmem:[%s3912_s3 + $0x10] sm:$0xff]  ;;  %v875_v14 = vld [vmem:[%s3912_s3 + $0x18] sm:$0xff] }
  0x25   : > { %2929 = vmatprep.subr.bf16.mxu0 %v3111_v2  ;;  %v872_v11 = vld [vmem:[%s3912_s3] sm:$0xff]  ;;  %v873_v18 = vld [vmem:[%s3912_s3 + $0x8] sm:$0xff] }
  0x28   : > { %2930 = vmatpush3.bf16.msra.mxu0 %v3111_v2 }
  0x29   : > { %2931 = vmatprep.subr.bf16.mxu0 %v3112_v4 }
  0x2c   : > { %2932 = vmatpush3.bf16.msra.mxu0 %v3112_v4 }
  0x2f   : > { %2934 = vmatmul.mubr.msk.bf16.vlgmr.msra.gmra.mrb[0].mxu0 %vm816_vm0, %v3114_v5 }
 0x102   : > { %v2935_v7 = vpop.f32.mrb[0].mxu0 }
 0x103   : > { %v866_v9 = vadd.f32 %v2935_v7, %v2796_v6  ;;  %v857_v10 = vpop.f32.mrb[1].mxu0 }
 0x104   : > { %v858_v12 = vadd.f32 %v2796_v6, %v857_v10  ;;  %v2936_v13 = vpop.f32.mrb[2].mxu0 }
 0x105   : > { %v878_v15 = vadd.f32 %v874_v8, %v866_v9  ;;  %v869_v16 = vadd.f32 %v2936_v13, %v2796_v6  ;;  %v860_v17 = vpop.f32.mrb[3].mxu0 }
 0x106   : > { %v876_v19 = vadd.f32 %v872_v11, %v858_v12  ;;  %v861_v20 = vadd.f32 %v2796_v6, %v860_v17 }
 0x107   : > { %883 = vst.msk [vmem:[#allocation2 + $0x10] sm:$0xff] %vm880_vm1, %v878_v15  ;;  %v879_v21 = vadd.f32 %v875_v14, %v869_v16 }
 0x108   : > { %881 = vst.msk [vmem:[#allocation2] sm:$0xff] %vm880_vm1, %v876_v19  ;;  %v877_v22 = vadd.f32 %v873_v18, %v861_v20 }
 0x109   : > { %884 = vst.msk [vmem:[#allocation2 + $0x18] sm:$0xff] %vm880_vm1, %v879_v21 }
 0x10a   : > { %882 = vst.msk [vmem:[#allocation2 + $0x8] sm:$0xff] %vm880_vm1, %v877_v22 }
 0x10b PF: > { %vm891_vm2 = vcmask 261120   ;;  %v3145_v51 = vld [vmem:[%s3399_s21] sm:$0xff]   ;;  %v3146_v52 = vld [vmem:[%s3399_s21 + $0x8] sm:$0xff]   ;;  %s3913_s17 = scalar_lea.vmem %s3874_s4, %s3381_s20  ;;  %s3914_s26 = scalar_lea.vmem %s3875_s5, %s3381_s20  ;;  %v3253_v21 = vmov 0.0   ;;  %vm3254_vm3 = vmmov 0   ;;  %vm1056_vm4 = vcmask 64512  }
 0x10c   : > { %2937 = vmatprep.subr.bf16.mxu0 %v3145_v51  ;;  %v2805_v3 = vld [vmem:[%s3913_s17] ss:$0 sm:$0xff]  ;;  %2957 = vmatprep.subr.bf16.mxu1 %v3253_v21  ;;  %s3915_s0 = scalar_lea.vmem %s3877_s7, %s3381_s20  ;;  %s3255_s1 = smov 96   ;;  %vm1154_vm5 = vcmask 130048   ;;  %vm2079_vm6 = vcmask 195584  }
 0x10d   : > { %2938 = vmatpush3.bf16.msra.mxu0 %v3145_v51  ;;  %v2806_v9 = vld [vmem:[%s3914_s26] ss:$0 sm:$0xff]  ;;  %2959 = vmatprep.mubr.msk.bf16.mxu1 %vm3254_vm3, %v3253_v21  ;;  %s3256_s21 = smov 64   ;;  %s3257_s16 = smov 88  }
 0x10e   : > { %v887_v24 = vld [vmem:[#allocation2 + $0x10] sm:$0xff]  ;;  %2939 = vmatprep.subr.bf16.mxu0 %v3146_v52  ;;  %v2807_v22 = vld [vmem:[%s3915_s0] ss:$0 sm:$0xff]  ;;  %s3258_s17 = smov 120   ;;  %s3259_s22 = smov 56  }
 0x10f   : > { %v885_v23 = vld [vmem:[#allocation2] sm:$0xff]  ;;  %v898_v27 = vsel %vm891_vm2, %v887_v24, 0.0  ;;  %s3260_s23 = smov 80   ;;  %s3261_s26 = smov 112  }
 0x110   : > { %v892_v26 = vsel %vm891_vm2, %v885_v23, 0.0  ;;  %v888_v28 = vld [vmem:[#allocation2 + $0x18] sm:$0xff]  ;;  %899 = vadd.xlane.f32.xlu1 %v898_v27  ;;  %s3262_s25 = smov 48   ;;  %s3263_s29 = smov 72  }
 0x111   : > { %v886_v25 = vld [vmem:[#allocation2 + $0x8] sm:$0xff]  ;;  %893 = vadd.xlane.f32.xlu0 %v892_v26  ;;  %v901_v30 = vsel %vm891_vm2, %v888_v28, 0.0  ;;  %2940 = vmatpush3.bf16.msra.mxu0 %v3146_v52  ;;  %s3264_s0 = smov 104   ;;  %p2849_p5 = scmp.ne.s32.totalorder %s3375_s30, 1 }
 0x112   : > { %v895_v29 = vsel %vm891_vm2, %v886_v25, 0.0  ;;  %2945 = vmatprep.subr.bf16.mxu0 %v3253_v21  ;;  %vm2636_vm7 = vcmask (!%p2849_p5), 1041409  }
 0x114   : > { %902 = vadd.xlane.f32.xlu1 %v901_v30 }
 0x115   : > { %896 = vadd.xlane.f32.xlu0 %v895_v29 }
 0x19d   : > { %v900_v32 = vpop.xlane.xlu1 %899 }
 0x19e   : > { %v894_v31 = vpop.xlane.xlu0 %893  ;;  %v907_v34 = vmul.f32 0.03125, %v900_v32 }
 0x19f   : > { %v905_v33 = vmul.f32 0.03125, %v894_v31 }
 0x1a0   : > { %v911_v36 = vsub.f32 %v887_v24, %v907_v34 }
 0x1a1   : > { %v909_v35 = vsub.f32 %v885_v23, %v905_v33  ;;  %v903_v38 = vpop.xlane.xlu1 %902 }
 0x1a2   : > { %v897_v37 = vpop.xlane.xlu0 %896  ;;  %v908_v40 = vmul.f32 0.03125, %v903_v38  ;;  %v915_v42 = vmul.f32 %v911_v36, %v911_v36 }
 0x1a3   : > { %v906_v39 = vmul.f32 0.03125, %v897_v37  ;;  %v913_v41 = vmul.f32 %v909_v35, %v909_v35 }
 0x1a4   : > { %v912_v44 = vsub.f32 %v888_v28, %v908_v40  ;;  %v923_v46 = vsel %vm891_vm2, %v915_v42, 0.0 }
 0x1a5   : > { %v910_v43 = vsub.f32 %v886_v25, %v906_v39  ;;  %v917_v45 = vsel %vm891_vm2, %v913_v41, 0.0 }
 0x1a6   : > { %918 = vadd.xlane.f32.xlu0 %v917_v45  ;;  %v916_v48 = vmul.f32 %v912_v44, %v912_v44 }
 0x1a7   : > { %v914_v47 = vmul.f32 %v910_v43, %v910_v43 }
 0x1a8   : > { %v926_v50 = vsel %vm891_vm2, %v916_v48, 0.0 }
 0x1a9   : > { %v920_v49 = vsel %vm891_vm2, %v914_v47, 0.0 }
 0x1aa   : > { %924 = vadd.xlane.f32.xlu0 %v923_v46  ;;  %921 = vadd.xlane.f32.xlu1 %v920_v49 }
 0x1ae   : > { %927 = vadd.xlane.f32.xlu1 %v926_v50 }
 0x233   : > { %v919_v53 = vpop.xlane.xlu0 %918 }
 0x234   : > { %v929_v54 = vmul.f32 0.03125, %v919_v53 }
 0x236   : > { %v933_v55 = vadd.f32 1e-05, %v929_v54 }
 0x237   : > { %v922_v56 = vpop.xlane.xlu1 %921  ;;  %v925_v57 = vpop.xlane.xlu0 %924 }
 0x238   : > { %3159 = vrsqrt.f32 %v933_v55  ;;  %v930_v58 = vmul.f32 0.03125, %v922_v56  ;;  %v931_v59 = vmul.f32 0.03125, %v925_v57 }
 0x23a   : > { %v934_v60 = vadd.f32 1e-05, %v930_v58  ;;  %v935_v61 = vadd.f32 1e-05, %v931_v59 }
 0x23b   : > { %v928_v62 = vpop.xlane.xlu1 %927 }
 0x23c   : > { %3161 = vrsqrt.f32 %v934_v60  ;;  %v932_v63 = vmul.f32 0.03125, %v928_v62 }
 0x23d   : > { %3163 = vrsqrt.f32 %v935_v61 }
 0x23e   : > { %v936_v0 = vadd.f32 1e-05, %v932_v63 }
 0x240   : > { %3165 = vrsqrt.f32 %v936_v0 }
 0x242   : > { %v3160_v1 = vpop.eup %3159 }
 0x243   : > { %v941_v2 = vmul.f32 %v3160_v1, %v909_v35 }
 0x245   : > { %v951_v7 = vmul.f32 %v2805_v3, %v941_v2 }
 0x246   : > { %v3162_v4 = vpop.eup %3161 }
 0x247   : > { %v3164_v5 = vpop.eup %3163  ;;  %v942_v6 = vmul.f32 %v3162_v4, %v910_v43  ;;  %v961_v13 = vadd.f32 %v2806_v9, %v951_v7 }
 0x248   : > { %v943_v8 = vmul.f32 %v3164_v5, %v911_v36 }
 0x249   : > { %v952_v10 = vmul.f32 %v2805_v3, %v942_v6 }
 0x24a   : > { %v3166_v11 = vpop.eup %3165  ;;  %v953_v15 = vmul.f32 %v2805_v3, %v943_v8 }
 0x24b   : > { %v944_v12 = vmul.f32 %v3166_v11, %v912_v44  ;;  %v962_v14 = vadd.f32 %v2806_v9, %v952_v10 }
 0x24c   : > { %v963_v18 = vadd.f32 %v2806_v9, %v953_v15 }
 0x24d   : > { %v965_v16 = vpack.c.bf16 %v962_v14, %v961_v13  ;;  %v954_v17 = vmul.f32 %v2805_v3, %v944_v12 }
 0x24f   : > { %2941 = vmatprep.mubr.msk.bf16.mxu0 %vm891_vm2, %v965_v16  ;;  %v964_v19 = vadd.f32 %v2806_v9, %v954_v17 }
 0x251   : > { %v966_v20 = vpack.c.bf16 %v964_v19, %v963_v18 }
 0x253   : > { %2942 = vmatmul.mubr.msk.bf16.vlgmr.msra.gmra.mrb[0].mxu0 %vm891_vm2, %v966_v20 }
 0x254   : > { %2947 = vmatprep.mubr.msk.bf16.mxu0 %vm3254_vm3, %v3253_v21 }
 0x326   : > { %v2943_v23 = vpop.f32.mrb[0].mxu0 }
 0x327   : > { %v1039_v24 = vadd.f32 %v2943_v23, %v2807_v22  ;;  %v1030_v25 = vpop.f32.mrb[1].mxu0 }
 0x328   : > { %v1031_v26 = vadd.f32 %v2807_v22, %v1030_v25  ;;  %v2944_v27 = vpop.f32.mrb[2].mxu0 }
 0x329   : > { %v1042_v28 = vadd.f32 %v2944_v27, %v2807_v22  ;;  %v1033_v29 = vpop.f32.mrb[3].mxu0  ;;  %v1047_v31 = vmul.f32 0.35355338, %v1039_v24 }
 0x32a   : > { %v1034_v30 = vadd.f32 %v2807_v22, %v1033_v29  ;;  %v1045_v34 = vmul.f32 0.35355338, %v1031_v26 }
 0x32b   : > { %v1048_v32 = vmul.f32 0.35355338, %v1042_v28  ;;  %v3504_v33 = vpack.c.bf16 %v1042_v28, %v1039_v24 }
 0x32c   : > { %v1046_v35 = vmul.f32 0.35355338, %v1034_v30  ;;  %v3506_v36 = vpack.c.bf16 %v1034_v30, %v1031_v26 }
 0x32d   : > { %v3508_v37 = vpack.c.bf16 %v1048_v32, %v1047_v31  ;;  %1105 = vrot.lane.b32.xlu1 %v3504_v33, %s3255_s1 }
 0x32e   : > { %v3511_v38 = vpack.c.bf16 %v1046_v35, %v1045_v34  ;;  %1054 = vrot.lane.b32.xlu0 %v3506_v36, %s3255_s1  ;;  %s3265_s1 = smov 40  }
 0x39f   : > { %v1106_v41 = vpop.permute.xlu1 %1105 }
 0x3a0   : > { %v1055_v39 = vpop.permute.xlu0 %1054  ;;  %v1111_v42 = vsel %vm1056_vm4, %v1106_v41, 0 }
 0x3a1   : > { %v1061_v40 = vsel %vm1056_vm4, %v1055_v39, 0 }
 0x3a2   : > { %2946 = vmatpush3.bf16.xpose.msra.mxu0 %v1061_v40 }
 0x3a3   : > { %2951 = vmatprep.subr.bf16.mxu0 %v3253_v21 }
 0x3a9   : > { %2948 = vmatmul.mubr.msk.bf16.vlgmr.msra.gmra.mrb[4].mxu0 %vm1056_vm4, %v3511_v38 }
 0x3aa   : > { %2952 = vmatpush3.bf16.xpose.msra.mxu0 %v1111_v42  ;;  %2953 = vmatprep.mubr.msk.bf16.mxu0 %vm3254_vm3, %v3253_v21 }
 0x3ab   : > { %2963 = vmatprep.subr.bf16.mxu0 %v3253_v21 }
 0x3b1   : > { %2954 = vmatmul.mubr.msk.bf16.vlgmr.msra.gmra.mrb[8].mxu0 %vm1056_vm4, %v3508_v37 }
 0x3b2   : > { %2965 = vmatprep.mubr.msk.bf16.mxu0 %vm3254_vm3, %v3253_v21 }
 0x47c   : > { %v1097_v43 = vpop.f32.mrb[4].mxu0 }
 0x47d   : > { %v2949_v44 = vpop.f32.mrb[5].mxu0  ;;  %v1155_v45 = vsel %vm1154_vm5, %v1097_v43, -inf }
 0x47e   : > { %1156 = vmax.xlane.f32.xlu1 %v1155_v45  ;;  %v1100_v46 = vpop.f32.mrb[6].mxu0 }
 0x47f   : > { %v2950_v47 = vpop.f32.mrb[7].mxu0  ;;  %v1158_v48 = vsel %vm1154_vm5, %v1100_v46, -inf }
 0x480   : > { %1159 = vmax.xlane.f32.xlu0 %v1158_v48 }
 0x484   : > { %v1147_v49 = vpop.f32.mrb[8].mxu0 }
 0x485   : > { %v2955_v50 = vpop.f32.mrb[9].mxu0  ;;  %v1161_v51 = vsel %vm1154_vm5, %v1147_v49, -inf }
 0x486   : > { %1162 = vmax.xlane.f32.xlu0 %v1161_v51  ;;  %v1150_v52 = vpop.f32.mrb[10].mxu0 }
 0x487   : > { %v2956_v53 = vpop.f32.mrb[11].mxu0  ;;  %v1164_v54 = vsel %vm1154_vm5, %v1150_v52, -inf }
 0x488   : > { %1165 = vmax.xlane.f32.xlu1 %v1164_v54 }
 0x50b   : > { %v1157_v55 = vpop.xlane.xlu1 %1156 }
 0x50c   : > { %v1167_v56 = vsub.f32 %v1097_v43, %v1157_v55 }
 0x50d   : > { %v1160_v57 = vpop.xlane.xlu0 %1159 }
 0x50e   : > { %v1171_v58 = vmul.f32 1.442695, %v1167_v56  ;;  %v1168_v59 = vsub.f32 %v1100_v46, %v1160_v57 }
 0x510   : > { %3167 = vpow2.f32 %v1171_v58  ;;  %v1173_v60 = vmul.f32 1.442695, %v1168_v59 }
 0x512   : > { %3169 = vpow2.f32 %v1173_v60 }
 0x513   : > { %v1163_v61 = vpop.xlane.xlu0 %1162 }
 0x514   : > { %v1169_v62 = vsub.f32 %v1147_v49, %v1163_v61 }
 0x515   : > { %v1166_v6 = vpop.xlane.xlu1 %1165 }
 0x516   : > { %v1175_v63 = vmul.f32 1.442695, %v1169_v62  ;;  %v1170_v7 = vsub.f32 %v1150_v52, %v1166_v6 }
 0x518   : > { %3171 = vpow2.f32 %v1175_v63  ;;  %v1177_v8 = vmul.f32 1.442695, %v1170_v7 }
 0x51a   : > { %v3168_v0 = vpop.eup %3167  ;;  %3173 = vpow2.f32 %v1177_v8 }
 0x51b   : > { %v1179_v1 = vsel %vm1154_vm5, %v3168_v0, 0.0 }
 0x51c   : > { %v3170_v2 = vpop.eup %3169  ;;  %1180 = vadd.xlane.f32.xlu0 %v1179_v1 }
 0x51d   : > { %v1182_v3 = vsel %vm1154_vm5, %v3170_v2, 0.0 }
 0x51e   : > { %1183 = vadd.xlane.f32.xlu1 %v1182_v3 }
 0x522   : > { %v3172_v4 = vpop.eup %3171 }
 0x523   : > { %v1185_v5 = vsel %vm1154_vm5, %v3172_v4, 0.0 }
 0x524   : > { %1186 = vadd.xlane.f32.xlu0 %v1185_v5  ;;  %v3174_v9 = vpop.eup %3173 }
 0x525   : > { %v1188_v10 = vsel %vm1154_vm5, %v3174_v9, 0.0 }
 0x52f   : > { %1248 = vrot.lane.b32.xlu1 %v3504_v33, %s3256_s21 }
 0x533   : > { %1298 = vrot.lane.b32.xlu1 %v3506_v36, %s3257_s16 }
 0x53a   : > { %1201 = vrot.lane.b32.xlu0 %v3506_v36, %s3256_s21  ;;  %s3266_s21 = smov 8  }
 0x53e   : > { %1296 = vrot.lane.b32.xlu0 %v3511_v38, %s3258_s17 }
 0x557   : > { %1189 = vadd.xlane.f32.xlu1 %v1188_v10 }
 0x568   : > { %1350 = vrot.lane.b32.xlu1 %v3504_v33, %s3257_s16  ;;  %s3267_s16 = smov 16  }
 0x56c   : > { %1348 = vrot.lane.b32.xlu1 %v3508_v37, %s3258_s17  ;;  %s3268_s17 = smov 24  }
 0x5a9   : > { %v1181_v11 = vpop.xlane.xlu0 %1180 }
 0x5aa   : > { %3175 = vrcp.f32 %v1181_v11 }
 0x5ab   : > { %v1184_v12 = vpop.xlane.xlu1 %1183 }
 0x5ac   : > { %3177 = vrcp.f32 %v1184_v12 }
 0x5af   : > { %v1249_v13 = vpop.permute.xlu1 %1248 }
 0x5b0   : > { %2964 = vmatpush3.bf16.msra.mxu0 %v1249_v13 }
 0x5b1   : > { %v1187_v14 = vpop.xlane.xlu0 %1186  ;;  %2975 = vmatprep.subr.bf16.mxu0 %v3253_v21 }
 0x5b2   : > { %3179 = vrcp.f32 %v1187_v14 }
 0x5b3   : > { %v1299_v22 = vpop.permute.xlu1 %1298 }
 0x5b4   : > { %v3176_v15 = vpop.eup %3175  ;;  %v1304_v23 = vsel %vm1056_vm4, %v1299_v22, 0 }
 0x5b5   : > { %v1202_v16 = vpop.permute.xlu0 %1201  ;;  %v3541_v18 = vmul.f32 %v3176_v15, %v3168_v0 }
 0x5b6   : > { %v3178_v17 = vpop.eup %3177  ;;  %2958 = vmatpush3.bf16.msra.mxu1 %v1202_v16 }
 0x5b7   : > { %v3543_v19 = vmul.f32 %v3178_v17, %v3170_v2  ;;  %2969 = vmatprep.subr.bf16.mxu1 %v3253_v21 }
 0x5b9   : > { %v1199_v20 = vpack.c.bf16 %v3543_v19, %v3541_v18  ;;  %v1297_v24 = vpop.permute.xlu0 %1296 }
 0x5bb   : > { %2960 = vmatmul.mubr.msk.bf16.vlgmr.msra.gmra.mrb[0].mxu1 %vm1154_vm5, %v1199_v20 }
 0x5bc   : > { %2971 = vmatprep.mubr.msk.bf16.mxu1 %vm3254_vm3, %v3253_v21  ;;  %v3180_v26 = vpop.eup %3179 }
 0x5bd   : > { %v3556_v28 = vmul.f32 %v3180_v26, %v3172_v4 }
 0x5bf   : > { %2970 = vmatpush3.bf16.xpose.msra.mxu1 %v1304_v23 }
 0x5c0   : > { %2981 = vmatprep.subr.bf16.mxu1 %v3253_v21 }
 0x5c6   : > { %2972 = vmatmul.mubr.msk.bf16.vlgmr.msra.gmra.mrb[4].mxu1 %vm1056_vm4, %v1297_v24 }
 0x5c7   : > { %2983 = vmatprep.mubr.msk.bf16.mxu1 %vm3254_vm3, %v3253_v21 }
 0x5e4   : > { %v1190_v25 = vpop.xlane.xlu1 %1189 }
 0x5e5   : > { %3181 = vrcp.f32 %v1190_v25 }
 0x5e8   : > { %v1351_v30 = vpop.permute.xlu1 %1350 }
 0x5e9   : > { %v1356_v32 = vsel %vm1056_vm4, %v1351_v30, 0 }
 0x5ec   : > { %v1349_v34 = vpop.permute.xlu1 %1348 }
 0x5ef   : > { %v3182_v27 = vpop.eup %3181 }
 0x5f0   : > { %v3558_v29 = vmul.f32 %v3182_v27, %v3174_v9 }
 0x5f2   : > { %v1200_v31 = vpack.c.bf16 %v3558_v29, %v3556_v28 }
 0x5f4   : > { %2966 = vmatmul.mubr.msk.bf16.vlgmr.msra.gmra.mrb[12].mxu0 %vm1154_vm5, %v1200_v31 }
 0x5f5   : > { %2976 = vmatpush3.bf16.xpose.msra.mxu0 %v1356_v32  ;;  %2977 = vmatprep.mubr.msk.bf16.mxu0 %vm3254_vm3, %v3253_v21 }
 0x5f6   : > { %2987 = vmatprep.subr.bf16.mxu0 %v3253_v21 }
 0x5fc   : > { %2978 = vmatmul.mubr.msk.bf16.vlgmr.msra.gmra.mrb[16].mxu0 %vm1056_vm4, %v1349_v34 }
 0x5fd   : > { %2989 = vmatprep.mubr.msk.bf16.mxu0 %vm3254_vm3, %v3253_v21 }
 0x68e   : > { %v3570_v35 = vpop.f32.mrb[0].mxu1 }
 0x68f   : > { %v2961_v39 = vpop.f32.mrb[1].mxu1 }
 0x690   : > { %v3572_v40 = vpop.f32.mrb[2].mxu1 }
 0x691   : > { %v2962_v41 = vpop.f32.mrb[3].mxu1 }
 0x699   : > { %v1340_v42 = vpop.f32.mrb[4].mxu1 }
 0x69a   : > { %v2973_v43 = vpop.f32.mrb[5].mxu1  ;;  %v1399_v44 = vsel %vm1154_vm5, %v1340_v42, -inf }
 0x69b   : > { %1400 = vmax.xlane.f32.xlu0 %v1399_v44  ;;  %v1343_v45 = vpop.f32.mrb[6].mxu1 }
 0x69c   : > { %v2974_v46 = vpop.f32.mrb[7].mxu1  ;;  %v1402_v47 = vsel %vm1154_vm5, %v1343_v45, -inf }
 0x69d   : > { %1403 = vmax.xlane.f32.xlu1 %v1402_v47 }
 0x6c7   : > { %v3576_v48 = vpop.f32.mrb[12].mxu0 }
 0x6c8   : > { %v2967_v49 = vpop.f32.mrb[13].mxu0 }
 0x6c9   : > { %v3578_v50 = vpop.f32.mrb[14].mxu0 }
 0x6ca   : > { %v2968_v51 = vpop.f32.mrb[15].mxu0 }
 0x6cf   : > { %v1392_v52 = vpop.f32.mrb[16].mxu0 }
 0x6d0   : > { %v2979_v53 = vpop.f32.mrb[17].mxu0  ;;  %v1405_v54 = vsel %vm1154_vm5, %v1392_v52, -inf }
 0x6d1   : > { %1406 = vmax.xlane.f32.xlu0 %v1405_v54  ;;  %v1395_v55 = vpop.f32.mrb[18].mxu0 }
 0x6d2   : > { %v2980_v56 = vpop.f32.mrb[19].mxu0  ;;  %v1408_v57 = vsel %vm1154_vm5, %v1395_v55, -inf }
 0x6d5   : > { %1409 = vmax.xlane.f32.xlu0 %v1408_v57 }
 0x728   : > { %v1401_v58 = vpop.xlane.xlu0 %1400 }
 0x729   : > { %v1411_v59 = vsub.f32 %v1340_v42, %v1401_v58 }
 0x72a   : > { %v1404_v60 = vpop.xlane.xlu1 %1403 }
 0x72b   : > { %v1415_v61 = vmul.f32 1.442695, %v1411_v59  ;;  %v1412_v62 = vsub.f32 %v1343_v45, %v1404_v60 }
 0x72d   : > { %3183 = vpow2.f32 %v1415_v61  ;;  %v1417_v63 = vmul.f32 1.442695, %v1412_v62 }
 0x72f   : > { %3185 = vpow2.f32 %v1417_v63 }
 0x737   : > { %v3184_v0 = vpop.eup %3183 }
 0x738   : > { %v1423_v1 = vsel %vm1154_vm5, %v3184_v0, 0.0 }
 0x739   : > { %v3186_v2 = vpop.eup %3185  ;;  %1424 = vadd.xlane.f32.xlu0 %v1423_v1 }
 0x73a   : > { %v1426_v3 = vsel %vm1154_vm5, %v3186_v2, 0.0 }
 0x73b   : > { %1427 = vadd.xlane.f32.xlu1 %v1426_v3 }
 0x74c   : > { %1492 = vrot.lane.b32.xlu1 %v3504_v33, %s3259_s22 }
 0x750   : > { %1541 = vrot.lane.b32.xlu1 %v3506_v36, %s3260_s23 }
 0x75e   : > { %v1407_v4 = vpop.xlane.xlu0 %1406 }
 0x75f   : > { %v1413_v5 = vsub.f32 %v1392_v52, %v1407_v4 }
 0x761   : > { %v1419_v6 = vmul.f32 1.442695, %v1413_v5 }
 0x762   : > { %v1410_v7 = vpop.xlane.xlu0 %1409 }
 0x763   : > { %3187 = vpow2.f32 %v1419_v6  ;;  %v1414_v8 = vsub.f32 %v1395_v55, %v1410_v7 }
 0x765   : > { %v1421_v9 = vmul.f32 1.442695, %v1414_v8 }
 0x767   : > { %3189 = vpow2.f32 %v1421_v9 }
 0x76d   : > { %v3188_v10 = vpop.eup %3187 }
 0x76e   : > { %v1429_v11 = vsel %vm1154_vm5, %v3188_v10, 0.0 }
 0x76f   : > { %1430 = vadd.xlane.f32.xlu0 %v1429_v11 }
 0x771   : > { %v3190_v12 = vpop.eup %3189 }
 0x772   : > { %v1432_v13 = vsel %vm1154_vm5, %v3190_v12, 0.0 }
 0x774   : > { %1433 = vadd.xlane.f32.xlu1 %v1432_v13 }
 0x785   : > { %1445 = vrot.lane.b32.xlu0 %v3506_v36, %s3259_s22  ;;  %1592 = vrot.lane.b32.xlu1 %v3504_v33, %s3260_s23  ;;  %s3916_s23 = scalar_lea.vmem %s3879_s9, %s3381_s20  ;;  %s3919_s22 = sld [smem:[#allocation13_spill]] (!%p2849_p5) }
 0x789   : > { %1539 = vrot.lane.b32.xlu0 %v3511_v38, %s3261_s26  ;;  %1590 = vrot.lane.b32.xlu1 %v3508_v37, %s3261_s26  ;;  %s3920_s26 = sld [smem:[#allocation11_spill]] (!%p2849_p5) }
 0x7c6   : > { %v1425_v16 = vpop.xlane.xlu0 %1424 }
 0x7c8   : > { %v1428_v14 = vpop.xlane.xlu1 %1427 }
 0x7c9   : > { %3191 = vrcp.f32 %v1428_v14 }
 0x7ca   : > { %3193 = vrcp.f32 %v1425_v16 }
 0x7cc   : > { %v1493_v15 = vpop.permute.xlu1 %1492 }
 0x7cd   : > { %2988 = vmatpush3.bf16.msra.mxu0 %v1493_v15 }
 0x7ce   : > { %2999 = vmatprep.subr.bf16.mxu0 %v3253_v21 }
 0x7d0   : > { %v1542_v23 = vpop.permute.xlu1 %1541 }
 0x7d1   : > { %v1547_v31 = vsel %vm1056_vm4, %v1542_v23, 0 }
 0x7d3   : > { %v3192_v17 = vpop.eup %3191 }
 0x7d4   : > { %v3194_v22 = vpop.eup %3193  ;;  %v3593_v24 = vmul.f32 %v3192_v17, %v3186_v2 }
 0x7d5   : > { %v3595_v25 = vmul.f32 %v3194_v22, %v3184_v0 }
 0x7d7   : > { %v1443_v30 = vpack.c.bf16 %v3593_v24, %v3595_v25 }
 0x7fc   : > { %v1431_v20 = vpop.xlane.xlu0 %1430 }
 0x7fd   : > { %3195 = vrcp.f32 %v1431_v20 }
 0x800   : > { %v1446_v26 = vpop.permute.xlu0 %1445 }
 0x801   : > { %v1434_v27 = vpop.xlane.xlu1 %1433  ;;  %2982 = vmatpush3.bf16.msra.mxu1 %v1446_v26 }
 0x802   : > { %3197 = vrcp.f32 %v1434_v27  ;;  %2993 = vmatprep.subr.bf16.mxu1 %v3253_v21 }
 0x804   : > { %2984 = vmatmul.mubr.msk.bf16.vlgmr.msra.gmra.mrb[8].mxu1 %vm1154_vm5, %v1443_v30  ;;  %v1540_v44 = vpop.permute.xlu0 %1539 }
 0x805   : > { %2995 = vmatprep.mubr.msk.bf16.mxu1 %vm3254_vm3, %v3253_v21  ;;  %v1593_v42 = vpop.permute.xlu1 %1592 }
 0x806   : > { %v1598_v45 = vsel %vm1056_vm4, %v1593_v42, 0 }
 0x807   : > { %v3196_v32 = vpop.eup %3195 }
 0x808   : > { %v3605_v39 = vmul.f32 %v3196_v32, %v3188_v10 }
 0x809   : > { %v1591_v46 = vpop.permute.xlu1 %1590 }
 0x80a   : > { %2994 = vmatpush3.bf16.xpose.msra.mxu1 %v1547_v31 }
 0x80b   : > { %3005 = vmatprep.subr.bf16.mxu1 %v3253_v21 }
 0x80c   : > { %v3198_v34 = vpop.eup %3197 }
 0x80d   : > { %v3607_v41 = vmul.f32 %v3198_v34, %v3190_v12 }
 0x80f   : > { %v1444_v43 = vpack.c.bf16 %v3607_v41, %v3605_v39 }
 0x811   : > { %2990 = vmatmul.mubr.msk.bf16.vlgmr.msra.gmra.mrb[20].mxu0 %vm1154_vm5, %v1444_v43  ;;  %2996 = vmatmul.mubr.msk.bf16.vlgmr.msra.gmra.mrb[12].mxu1 %vm1056_vm4, %v1540_v44 }
 0x812   : > { %3000 = vmatpush3.bf16.xpose.msra.mxu0 %v1598_v45  ;;  %3001 = vmatprep.mubr.msk.bf16.mxu0 %vm3254_vm3, %v3253_v21 }
 0x813   : > { %3011 = vmatprep.subr.bf16.mxu0 %v3253_v21  ;;  %3007 = vmatprep.mubr.msk.bf16.mxu1 %vm3254_vm3, %v3253_v21 }
 0x819   : > { %3002 = vmatmul.mubr.msk.bf16.vlgmr.msra.gmra.mrb[24].mxu0 %vm1056_vm4, %v1591_v46 }
 0x81a   : > { %3013 = vmatprep.mubr.msk.bf16.mxu0 %vm3254_vm3, %v3253_v21 }
 0x8d7   : > { %v3622_v47 = vpop.f32.mrb[8].mxu1 }
 0x8d8   : > { %v2985_v49 = vpop.f32.mrb[9].mxu1 }
 0x8d9   : > { %v3624_v51 = vpop.f32.mrb[10].mxu1 }
 0x8da   : > { %v3115_v52 = vpack.i.bf16 %v3624_v51, %v3622_v47  ;;  %v2986_v53 = vpop.f32.mrb[11].mxu1 }
 0x8e4   : > { %v3628_v54 = vpop.f32.mrb[20].mxu0  ;;  %v1583_v55 = vpop.f32.mrb[12].mxu1 }
 0x8e5   : > { %v2991_v56 = vpop.f32.mrb[21].mxu0  ;;  %v2997_v57 = vpop.f32.mrb[13].mxu1  ;;  %v1641_v58 = vsel %vm1154_vm5, %v1583_v55, -inf }
 0x8e6   : > { %1642 = vmax.xlane.f32.xlu0 %v1641_v58  ;;  %v3631_v59 = vpop.f32.mrb[22].mxu0  ;;  %v1586_v60 = vpop.f32.mrb[14].mxu1 }
 0x8e7   : > { %v3120_v61 = vpack.i.bf16 %v3631_v59, %v3628_v54  ;;  %v2992_v62 = vpop.f32.mrb[23].mxu0  ;;  %v2998_v63 = vpop.f32.mrb[15].mxu1  ;;  %v1644_v0 = vsel %vm1154_vm5, %v1586_v60, -inf }
 0x8e8   : > { %1645 = vmax.xlane.f32.xlu1 %v1644_v0 }
 0x8ec   : > { %v1634_v1 = vpop.f32.mrb[24].mxu0 }
 0x8ed   : > { %v3003_v2 = vpop.f32.mrb[25].mxu0  ;;  %v1647_v3 = vsel %vm1154_vm5, %v1634_v1, -inf }
 0x8ee   : > { %1648 = vmax.xlane.f32.xlu0 %v1647_v3  ;;  %v1637_v4 = vpop.f32.mrb[26].mxu0 }
 0x8ef   : > { %v3004_v5 = vpop.f32.mrb[27].mxu0  ;;  %v1650_v6 = vsel %vm1154_vm5, %v1637_v4, -inf }
 0x8f2   : > { %1651 = vmax.xlane.f32.xlu0 %v1650_v6 }
 0x973   : > { %v1643_v7 = vpop.xlane.xlu0 %1642 }
 0x974   : > { %v1653_v8 = vsub.f32 %v1583_v55, %v1643_v7 }
 0x975   : > { %v1646_v9 = vpop.xlane.xlu1 %1645 }
 0x976   : > { %v1657_v10 = vmul.f32 1.442695, %v1653_v8  ;;  %v1654_v11 = vsub.f32 %v1586_v60, %v1646_v9 }
 0x978   : > { %3199 = vpow2.f32 %v1657_v10  ;;  %v1659_v12 = vmul.f32 1.442695, %v1654_v11 }
 0x97a   : > { %3201 = vpow2.f32 %v1659_v12 }
 0x97b   : > { %v1649_v13 = vpop.xlane.xlu0 %1648 }
 0x97c   : > { %v1655_v14 = vsub.f32 %v1634_v1, %v1649_v13 }
 0x97e   : > { %v1661_v15 = vmul.f32 1.442695, %v1655_v14 }
 0x97f   : > { %v1652_v27 = vpop.xlane.xlu0 %1651 }
 0x980   : > { %3203 = vpow2.f32 %v1661_v15  ;;  %v1656_v30 = vsub.f32 %v1637_v4, %v1652_v27 }
 0x982   : > { %v3200_v16 = vpop.eup %3199  ;;  %v1663_v31 = vmul.f32 1.442695, %v1656_v30 }
 0x983   : > { %v1665_v17 = vsel %vm1154_vm5, %v3200_v16, 0.0 }
 0x984   : > { %v3202_v20 = vpop.eup %3201  ;;  %1666 = vadd.xlane.f32.xlu0 %v1665_v17  ;;  %3205 = vpow2.f32 %v1663_v31 }
 0x985   : > { %v1668_v22 = vsel %vm1154_vm5, %v3202_v20, 0.0 }
 0x986   : > { %1669 = vadd.xlane.f32.xlu1 %v1668_v22 }
 0x98a   : > { %v3204_v23 = vpop.eup %3203 }
 0x98b   : > { %v1671_v26 = vsel %vm1154_vm5, %v3204_v23, 0.0 }
 0x98c   : > { %1672 = vadd.xlane.f32.xlu0 %v1671_v26 }
 0x98e   : > { %v3206_v32 = vpop.eup %3205 }
 0x98f   : > { %v1674_v34 = vsel %vm1154_vm5, %v3206_v32, 0.0 }
 0x997   : > { %1734 = vrot.lane.b32.xlu1 %v3504_v33, %s3262_s25 }
 0x99b   : > { %1783 = vrot.lane.b32.xlu1 %v3506_v36, %s3263_s29 }
 0x9a2   : > { %1687 = vrot.lane.b32.xlu0 %v3506_v36, %s3262_s25 }
 0x9a6   : > { %1781 = vrot.lane.b32.xlu0 %v3511_v38, %s3264_s0 }
 0x9bf   : > { %1675 = vadd.xlane.f32.xlu1 %v1674_v34 }
 0x9d0   : > { %1834 = vrot.lane.b32.xlu1 %v3504_v33, %s3263_s29 }
 0x9d4   : > { %1832 = vrot.lane.b32.xlu1 %v3508_v37, %s3264_s0  ;;  %s3917_s0 = scalar_lea.vmem %s3885_s15, %s3381_s20 }
 0xa11   : > { %v1667_v42 = vpop.xlane.xlu0 %1666 }
 0xa12   : > { %3207 = vrcp.f32 %v1667_v42 }
 0xa13   : > { %v1670_v43 = vpop.xlane.xlu1 %1669 }
 0xa14   : > { %3209 = vrcp.f32 %v1670_v43 }
 0xa17   : > { %v1735_v44 = vpop.permute.xlu1 %1734 }
 0xa18   : > { %3012 = vmatpush3.bf16.msra.mxu0 %v1735_v44 }
 0xa19   : > { %v1673_v45 = vpop.xlane.xlu0 %1672  ;;  %3023 = vmatprep.subr.bf16.mxu0 %v3253_v21 }
 0xa1a   : > { %3211 = vrcp.f32 %v1673_v45 }
 0xa1b   : > { %v1784_v56 = vpop.permute.xlu1 %1783 }
 0xa1c   : > { %v3208_v38 = vpop.eup %3207  ;;  %v1789_v57 = vsel %vm1056_vm4, %v1784_v56, 0 }
 0xa1d   : > { %v1688_v46 = vpop.permute.xlu0 %1687  ;;  %v3649_v53 = vmul.f32 %v3208_v38, %v3200_v16 }
 0xa1e   : > { %v3210_v49 = vpop.eup %3209  ;;  %3006 = vmatpush3.bf16.msra.mxu1 %v1688_v46 }
 0xa1f   : > { %v3651_v55 = vmul.f32 %v3210_v49, %v3202_v20  ;;  %3017 = vmatprep.subr.bf16.mxu1 %v3253_v21 }
 0xa21   : > { %v1685_v37 = vpack.c.bf16 %v3651_v55, %v3649_v53  ;;  %v1782_v58 = vpop.permute.xlu0 %1781 }
 0xa23   : > { %3008 = vmatmul.mubr.msk.bf16.vlgmr.msra.gmra.mrb[16].mxu1 %vm1154_vm5, %v1685_v37 }
 0xa24   : > { %3019 = vmatprep.mubr.msk.bf16.mxu1 %vm3254_vm3, %v3253_v21  ;;  %v3212_v62 = vpop.eup %3211 }
 0xa25   : > { %v3664_v0 = vmul.f32 %v3212_v62, %v3204_v23 }
 0xa27   : > { %3018 = vmatpush3.bf16.xpose.msra.mxu1 %v1789_v57 }
 0xa28   : > { %3029 = vmatprep.subr.bf16.mxu1 %v3253_v21 }
 0xa2e   : > { %3020 = vmatmul.mubr.msk.bf16.vlgmr.msra.gmra.mrb[20].mxu1 %vm1056_vm4, %v1782_v58 }
 0xa2f   : > { %3031 = vmatprep.mubr.msk.bf16.mxu1 %vm3254_vm3, %v3253_v21 }
 0xa4c   : > { %v1676_v60 = vpop.xlane.xlu1 %1675 }
 0xa4d   : > { %3213 = vrcp.f32 %v1676_v60 }
 0xa50   : > { %v1835_v2 = vpop.permute.xlu1 %1834 }
 0xa51   : > { %v1840_v4 = vsel %vm1056_vm4, %v1835_v2, 0 }
 0xa54   : > { %v1833_v5 = vpop.permute.xlu1 %1832 }
 0xa57   : > { %v3214_v63 = vpop.eup %3213 }
 0xa58   : > { %v3666_v1 = vmul.f32 %v3214_v63, %v3206_v32 }
 0xa5a   : > { %v1686_v3 = vpack.c.bf16 %v3666_v1, %v3664_v0 }
 0xa5c   : > { %3014 = vmatmul.mubr.msk.bf16.vlgmr.msra.gmra.mrb[28].mxu0 %vm1154_vm5, %v1686_v3 }
 0xa5d   : > { %3024 = vmatpush3.bf16.xpose.msra.mxu0 %v1840_v4  ;;  %3025 = vmatprep.mubr.msk.bf16.mxu0 %vm3254_vm3, %v3253_v21 }
 0xa5e   : > { %3035 = vmatprep.subr.bf16.mxu0 %v3253_v21 }
 0xa64   : > { %3026 = vmatmul.mubr.msk.bf16.vlgmr.msra.gmra.mrb[32].mxu0 %vm1056_vm4, %v1833_v5 }
 0xa65   : > { %3037 = vmatprep.mubr.msk.bf16.mxu0 %vm3254_vm3, %v3253_v21 }
 0xaf6   : > { %v1727_v6 = vpop.f32.mrb[16].mxu1 }
 0xaf7   : > { %v3009_v7 = vpop.f32.mrb[17].mxu1 }
 0xaf8   : > { %v1730_v8 = vpop.f32.mrb[18].mxu1 }
 0xaf9   : > { %v3125_v9 = vpack.i.bf16 %v1730_v8, %v1727_v6  ;;  %v3010_v10 = vpop.f32.mrb[19].mxu1 }
 0xb01   : > { %v1825_v11 = vpop.f32.mrb[20].mxu1 }
 0xb02   : > { %v3021_v12 = vpop.f32.mrb[21].mxu1  ;;  %v1883_v13 = vsel %vm1154_vm5, %v1825_v11, -inf }
 0xb03   : > { %1884 = vmax.xlane.f32.xlu0 %v1883_v13  ;;  %v1828_v14 = vpop.f32.mrb[22].mxu1 }
 0xb04   : > { %v3022_v15 = vpop.f32.mrb[23].mxu1  ;;  %v1886_v16 = vsel %vm1154_vm5, %v1828_v14, -inf }
 0xb05   : > { %1887 = vmax.xlane.f32.xlu1 %v1886_v16  ;;  %v3147_v16 = vld [vmem:[%s3404_s18] sm:$0xff]  }
 0xb2f   : > { %v1774_v17 = vpop.f32.mrb[28].mxu0 }
 0xb30   : > { %v3015_v20 = vpop.f32.mrb[29].mxu0 }
 0xb31   : > { %v1777_v22 = vpop.f32.mrb[30].mxu0 }
 0xb32   : > { %v3130_v23 = vpack.i.bf16 %v1777_v22, %v1774_v17  ;;  %v3016_v21 = vpop.f32.mrb[31].mxu0 }
 0xb37   : > { %v1876_v26 = vpop.f32.mrb[32].mxu0 }
 0xb38   : > { %v3027_v27 = vpop.f32.mrb[33].mxu0  ;;  %v1889_v30 = vsel %vm1154_vm5, %v1876_v26, -inf }
 0xb39   : > { %1890 = vmax.xlane.f32.xlu0 %v1889_v30  ;;  %v1879_v31 = vpop.f32.mrb[34].mxu0 }
 0xb3a   : > { %v3028_v32 = vpop.f32.mrb[35].mxu0  ;;  %v1892_v34 = vsel %vm1154_vm5, %v1879_v31, -inf }
 0xb3d   : > { %1893 = vmax.xlane.f32.xlu0 %v1892_v34 }
 0xb90   : > { %v1885_v42 = vpop.xlane.xlu0 %1884 }
 0xb91   : > { %v1895_v43 = vsub.f32 %v1825_v11, %v1885_v42 }
 0xb92   : > { %v1888_v44 = vpop.xlane.xlu1 %1887 }
 0xb93   : > { %v1899_v45 = vmul.f32 1.442695, %v1895_v43  ;;  %v1896_v38 = vsub.f32 %v1828_v14, %v1888_v44 }
 0xb95   : > { %3215 = vpow2.f32 %v1899_v45  ;;  %v1901_v46 = vmul.f32 1.442695, %v1896_v38 }
 0xb97   : > { %3217 = vpow2.f32 %v1901_v46 }
 0xb9f   : > { %v3216_v49 = vpop.eup %3215 }
 0xba0   : > { %v1907_v37 = vsel %vm1154_vm5, %v3216_v49, 0.0 }
 0xba1   : > { %v3218_v56 = vpop.eup %3217  ;;  %1908 = vadd.xlane.f32.xlu0 %v1907_v37 }
 0xba2   : > { %v1910_v57 = vsel %vm1154_vm5, %v3218_v56, 0.0 }
 0xba3   : > { %1911 = vadd.xlane.f32.xlu1 %v1910_v57 }
 0xbc6   : > { %v1891_v58 = vpop.xlane.xlu0 %1890 }
 0xbc7   : > { %v1897_v60 = vsub.f32 %v1876_v26, %v1891_v58  ;;  %v3148_v26 = vld [vmem:[%s3404_s18 + $0x8] sm:$0xff]  }
 0xbc9   : > { %v1903_v62 = vmul.f32 1.442695, %v1897_v60 }
 0xbca   : > { %v1894_v63 = vpop.xlane.xlu0 %1893 }
 0xbcb   : > { %3219 = vpow2.f32 %v1903_v62  ;;  %v1898_v2 = vsub.f32 %v1879_v31, %v1894_v63 }
 0xbcd   : > { %v1905_v3 = vmul.f32 1.442695, %v1898_v2 }
 0xbcf   : > { %3221 = vpow2.f32 %v1905_v3 }
 0xbd5   : > { %v3220_v4 = vpop.eup %3219 }
 0xbd6   : > { %v1913_v5 = vsel %vm1154_vm5, %v3220_v4, 0.0 }
 0xbd7   : > { %1914 = vadd.xlane.f32.xlu0 %v1913_v5 }
 0xbd9   : > { %v3222_v6 = vpop.eup %3221 }
 0xbda   : > { %v1916_v7 = vsel %vm1154_vm5, %v3222_v6, 0.0 }
 0xbdb   : > { %1917 = vadd.xlane.f32.xlu1 %v1916_v7 }
 0xbec   : > { %1976 = vrot.lane.b32.xlu1 %v3504_v33, %s3265_s1 }
 0xbed   : > { %1929 = vrot.lane.b32.xlu0 %v3506_v36, %s3265_s1 }
 0xbf0   : > { %3116 = vrot.lane.b32.xlu1 %v3115_v52, %s3266_s21 }
 0xbf1   : > { %3126 = vrot.lane.b32.xlu0 %v3125_v9, %s3267_s16 }
 0xbf4   : > { %3121 = vrot.lane.b32.xlu1 %v3120_v61, %s3266_s21  ;;  %s3918_s21 = sld [smem:[#allocation10_spill]] (!%p2849_p5) }
 0xbf8   : > { %3131 = vrot.lane.b32.xlu1 %v3130_v23, %s3267_s16 }
 0xc2e   : > { %v1909_v10 = vpop.xlane.xlu0 %1908 }
 0xc30   : > { %v1912_v8 = vpop.xlane.xlu1 %1911 }
 0xc31   : > { %3223 = vrcp.f32 %v1912_v8 }
 0xc32   : > { %3225 = vrcp.f32 %v1909_v10 }
 0xc3b   : > { %v3224_v11 = vpop.eup %3223 }
 0xc3c   : > { %v3226_v12 = vpop.eup %3225  ;;  %v3694_v36 = vmul.f32 %v3224_v11, %v3218_v56 }
 0xc3d   : > { %v3696_v47 = vmul.f32 %v3226_v12, %v3216_v49 }
 0xc3f   : > { %v1927_v54 = vpack.c.bf16 %v3694_v36, %v3696_v47 }
 0xc64   : > { %v1915_v33 = vpop.xlane.xlu0 %1914 }
 0xc65   : > { %3227 = vrcp.f32 %v1915_v33 }
 0xc68   : > { %v1918_v51 = vpop.xlane.xlu1 %1917  ;;  %v1930_v52 = vpop.permute.xlu0 %1929 }
 0xc69   : > { %3229 = vrcp.f32 %v1918_v51  ;;  %3030 = vmatpush3.bf16.msra.mxu1 %v1930_v52 }
 0xc6a   : > { %3041 = vmatprep.subr.bf16.mxu1 %v3147_v16 }
 0xc6c   : > { %v1977_v59 = vpop.permute.xlu1 %1976  ;;  %3032 = vmatmul.mubr.msk.bf16.vlgmr.msra.gmra.mrb[24].mxu1 %vm1154_vm5, %v1927_v54  ;;  %v3127_v45 = vpop.permute.xlu0 %3126 }
 0xc6d   : > { %3036 = vmatpush3.bf16.msra.mxu0 %v1977_v59  ;;  %3042 = vmatpush3.bf16.msra.mxu1 %v3147_v16  ;;  %v3129_v49 = vunpack.i.h.bf16 %v3127_v45  ;;  %v3128_v37 = vunpack.i.l.bf16 %v3127_v45 }
 0xc6e   : > { %3043 = vmatprep.subr.bf16.mxu1 %v3148_v26 }
 0xc6f   : > { %v3228_v61 = vpop.eup %3227 }
 0xc70   : > { %v3701_v13 = vmul.f32 %v3228_v61, %v3220_v4  ;;  %v3117_v42 = vpop.permute.xlu1 %3116 }
 0xc71   : > { %3044 = vmatpush3.bf16.msra.mxu1 %v3148_v26  ;;  %v3119_v43 = vunpack.i.h.bf16 %v3117_v42  ;;  %v3118_v44 = vunpack.i.l.bf16 %v3117_v42  ;;  %v3241_v26 = vld [vmem:[#allocation2 + $0x8] sm:$0xff] }
 0xc73   : > { %v3230_v9 = vpop.eup %3229  ;;  %v2072_v38 = vsel %vm1056_vm4, %v3572_v40, %v3119_v43  ;;  %v2071_v46 = vsel %vm1056_vm4, %v3570_v35, %v3118_v44 }
 0xc74   : > { %v3703_v14 = vmul.f32 %v3230_v9, %v3222_v6  ;;  %v3122_v57 = vpop.permute.xlu1 %3121  ;;  %v2075_v62 = vsel %vm1154_vm5, %v2071_v46, %v3128_v37  ;;  %v2076_v63 = vsel %vm1154_vm5, %v2072_v38, %v3129_v49 }
 0xc75   : > { %v3124_v35 = vunpack.i.h.bf16 %v3122_v57  ;;  %v3123_v5 = vunpack.i.l.bf16 %v3122_v57 }
 0xc76   : > { %v1928_v15 = vpack.c.bf16 %v3703_v14, %v3701_v13 }
 0xc77   : > { %v2074_v10 = vsel %vm1056_vm4, %v3578_v50, %v3124_v35  ;;  %v2073_v11 = vsel %vm1056_vm4, %v3576_v48, %v3123_v5  ;;  %v2832_v50 = vld [vmem:[%s3916_s23] ss:$0 sm:$0xff] }
 0xc78   : > { %3038 = vmatmul.mubr.msk.bf16.vlgmr.msra.gmra.mrb[36].mxu0 %vm1154_vm5, %v1928_v15  ;;  %v3132_v40 = vpop.permute.xlu1 %3131  ;;  %v3239_v15 = vld [vmem:[#allocation2 + $0x10] sm:$0xff] }
 0xc79   : > { %v3134_v6 = vunpack.i.h.bf16 %v3132_v40  ;;  %v3133_v7 = vunpack.i.l.bf16 %v3132_v40 }
 0xc7b   : > { %v2077_v51 = vsel %vm1154_vm5, %v2073_v11, %v3133_v7  ;;  %v2078_v52 = vsel %vm1154_vm5, %v2074_v10, %v3134_v6 }
 0xd3f   : > { %v1969_v17 = vpop.f32.mrb[24].mxu1 }
 0xd40   : > { %v3033_v20 = vpop.f32.mrb[25].mxu1 }
 0xd41   : > { %v1972_v22 = vpop.f32.mrb[26].mxu1 }
 0xd42   : > { %v3135_v23 = vpack.i.bf16 %v1972_v22, %v1969_v17  ;;  %v3034_v21 = vpop.f32.mrb[27].mxu1  ;;  %v3240_v17 = vld [vmem:[#allocation2] sm:$0xff] }
 0xd44   : > { %3136 = vrot.lane.b32.xlu0 %v3135_v23, %s3268_s17 }
 0xd4b   : > { %v2016_v27 = vpop.f32.mrb[36].mxu0 }
 0xd4c   : > { %v3039_v30 = vpop.f32.mrb[37].mxu0 }
 0xd4d   : > { %v2019_v31 = vpop.f32.mrb[38].mxu0 }
 0xd4e   : > { %v3140_v32 = vpack.i.bf16 %v2019_v31, %v2016_v27  ;;  %v3040_v34 = vpop.f32.mrb[39].mxu0  ;;  %v3242_v31 = vld [vmem:[#allocation2 + $0x18] sm:$0xff] }
 0xd50   : > { %3141 = vrot.lane.b32.xlu1 %v3140_v32, %s3268_s17 }
 0xdb6   : > { %v3137_v56 = vpop.permute.xlu0 %3136 }
 0xdb7   : > { %v3139_v58 = vunpack.i.h.bf16 %v3137_v56  ;;  %v3138_v60 = vunpack.i.l.bf16 %v3137_v56 }
 0xdb9   : > { %v2080_v2 = vsel %vm2079_vm6, %v2075_v62, %v3138_v60  ;;  %v2081_v3 = vsel %vm2079_vm6, %v2076_v63, %v3139_v58 }
 0xdba   : > { %v2084_v4 = vpack.c.bf16 %v2081_v3, %v2080_v2 }
 0xdbc   : > { %3045 = vmatprep.mubr.msk.bf16.mxu1 %vm891_vm2, %v2084_v4 }
 0xdc2   : > { %v3142_v8 = vpop.permute.xlu1 %3141 }
 0xdc3   : > { %v3144_v33 = vunpack.i.h.bf16 %v3142_v8  ;;  %v3143_v12 = vunpack.i.l.bf16 %v3142_v8 }
 0xdc5   : > { %v2083_v54 = vsel %vm2079_vm6, %v2078_v52, %v3144_v33  ;;  %v2082_v59 = vsel %vm2079_vm6, %v2077_v51, %v3143_v12  ;;  %v3149_v33 = vld [vmem:[%s3421_s6] sm:$0xff]   ;;  %v3150_v12 = vld [vmem:[%s3421_s6 + $0x8] sm:$0xff]  }
 0xdc6   : > { %v2085_v61 = vpack.c.bf16 %v2083_v54, %v2082_v59  ;;  %3049 = vmatprep.subr.bf16.mxu0 %v3149_v33  ;;  %v3151_v51 = vld [vmem:[%s3431_s2] sm:$0xff]   ;;  %v3152_v52 = vld [vmem:[%s3431_s2 + $0x8] sm:$0xff]   ;;  %v3153_v54 = vld [vmem:[%s3431_s2 + $0x10] sm:$0xff]  }
 0xdc7   : > { %3050 = vmatpush3.bf16.msra.mxu0 %v3149_v33  ;;  %3057 = vmatprep.subr.bf16.mxu1 %v3151_v51  ;;  %v3154_v59 = vld [vmem:[%s3431_s2 + $0x18] sm:$0xff]  }
 0xdc8   : > { %3046 = vmatmul.mubr.msk.bf16.vlgmr.msra.gmra.mrb[28].mxu1 %vm891_vm2, %v2085_v61  ;;  %3051 = vmatprep.subr.bf16.mxu0 %v3150_v12  ;;  %v3155_v61 = vld [vmem:[%s3431_s2 + $0x20] sm:$0xff]  }
 0xdc9   : > { %3058 = vmatpush3.bf16.msra.mxu1 %v3151_v51 }
 0xdca   : > { %3059 = vmatprep.subr.bf16.mxu1 %v3152_v52 }
 0xdcb   : > { %3052 = vmatpush3.bf16.msra.mxu0 %v3150_v12 }
 0xdcd   : > { %3060 = vmatpush3.bf16.msra.mxu1 %v3152_v52 }
 0xdce   : > { %3061 = vmatprep.subr.bf16.mxu1 %v3153_v54 }
 0xdd1   : > { %3062 = vmatpush3.bf16.msra.mxu1 %v3153_v54 }
 0xdd2   : > { %3063 = vmatprep.subr.bf16.mxu1 %v3154_v59 }
 0xdd5   : > { %3064 = vmatpush3.bf16.msra.mxu1 %v3154_v59 }
 0xdd6   : > { %3065 = vmatprep.subr.bf16.mxu1 %v3155_v61 }
 0xdd9   : > { %3066 = vmatpush3.bf16.msra.mxu1 %v3155_v61 }
 0xe9b   : > { %v3047_v9 = vpop.f32.mrb[28].mxu1 }
 0xe9c   : > { %v2142_v48 = vpop.f32.mrb[29].mxu1  ;;  %v2159_v16 = vadd.f32 %v3239_v15, %v3047_v9  ;;  %v3156_v9 = vld [vmem:[%s3431_s2 + $0x28] sm:$0xff]  }
 0xe9d   : > { %v2157_v20 = vadd.f32 %v3240_v17, %v2142_v48  ;;  %v3048_v22 = vpop.f32.mrb[30].mxu1  ;;  %3067 = vmatprep.subr.bf16.mxu1 %v3156_v9 }
 0xe9e   : > { %v2145_v23 = vpop.f32.mrb[31].mxu1  ;;  %v3735_v30 = vadd.f32 %v2832_v50, %v2159_v16  ;;  %v2160_v32 = vadd.f32 %v3242_v31, %v3048_v22  ;;  %3068 = vmatpush3.bf16.msra.mxu1 %v3156_v9 }
 0xe9f   : > { %v3733_v21 = vadd.f32 %v2832_v50, %v2157_v20  ;;  %v2158_v27 = vadd.f32 %v3241_v26, %v2145_v23 }
 0xea0   : > { %v3743_v44 = vadd.f32 %v2832_v50, %v2160_v32  ;;  %v2180_v45 = vsel %vm891_vm2, %v3735_v30, 0.0 }
 0xea1   : > { %v3737_v34 = vadd.f32 %v2832_v50, %v2158_v27  ;;  %v2174_v42 = vsel %vm891_vm2, %v3733_v21, 0.0 }
 0xea2   : > { %2175 = vadd.xlane.f32.xlu0 %v2174_v42  ;;  %v2183_v38 = vsel %vm891_vm2, %v3743_v44, 0.0 }
 0xea3   : > { %v2177_v43 = vsel %vm891_vm2, %v3737_v34, 0.0 }
 0xea4   : > { %2178 = vadd.xlane.f32.xlu1 %v2177_v43  ;;  %v2833_v43 = vld [vmem:[%s738_s19] ss:$0 sm:$0xff]  ;;  %s3921_s19 = sld [smem:[#allocation12_spill]] (!%p2849_p5) }
 0xea6   : > { %2181 = vadd.xlane.f32.xlu0 %v2180_v45 }
 0xeaa   : > { %2184 = vadd.xlane.f32.xlu0 %v2183_v38 }
 0xf2f   : > { %v2176_v46 = vpop.xlane.xlu0 %2175 }
 0xf30   : > { %v2186_v49 = vmul.f32 0.03125, %v2176_v46 }
 0xf31   : > { %v2179_v37 = vpop.xlane.xlu1 %2178 }
 0xf32   : > { %v3750_v56 = vsub.f32 %v3733_v21, %v2186_v49  ;;  %v2187_v57 = vmul.f32 0.03125, %v2179_v37 }
 0xf33   : > { %v2182_v58 = vpop.xlane.xlu0 %2181 }
 0xf34   : > { %v2191_v60 = vsub.f32 %v3737_v34, %v2187_v57  ;;  %v2188_v62 = vmul.f32 0.03125, %v2182_v58  ;;  %v2194_v63 = vmul.f32 %v3750_v56, %v3750_v56  ;;  %v2834_v57 = vld [vmem:[%s741_s27] ss:$0 sm:$0xff] }
 0xf36   : > { %v3756_v2 = vsub.f32 %v3735_v30, %v2188_v62  ;;  %v2198_v3 = vsel %vm891_vm2, %v2194_v63, 0.0  ;;  %v2195_v4 = vmul.f32 %v2191_v60, %v2191_v60 }
 0xf37   : > { %2199 = vadd.xlane.f32.xlu0 %v2198_v3  ;;  %v2185_v40 = vpop.xlane.xlu0 %2184 }
 0xf38   : > { %v2189_v35 = vmul.f32 0.03125, %v2185_v40  ;;  %v2201_v5 = vsel %vm891_vm2, %v2195_v4, 0.0  ;;  %v2196_v6 = vmul.f32 %v3756_v2, %v3756_v2 }
 0xf39   : > { %2202 = vadd.xlane.f32.xlu1 %v2201_v5 }
 0xf3a   : > { %v2193_v7 = vsub.f32 %v3743_v44, %v2189_v35  ;;  %v2204_v8 = vsel %vm891_vm2, %v2196_v6, 0.0 }
 0xf3b   : > { %2205 = vadd.xlane.f32.xlu0 %v2204_v8 }
 0xf3c   : > { %v2197_v10 = vmul.f32 %v2193_v7, %v2193_v7 }
 0xf3e   : > { %v2207_v11 = vsel %vm891_vm2, %v2197_v10, 0.0  ;;  %v3157_v10 = vld [vmem:[%s3431_s2 + $0x30] sm:$0xff]  }
 0xf3f   : > { %2208 = vadd.xlane.f32.xlu1 %v2207_v11  ;;  %3069 = vmatprep.subr.bf16.mxu1 %v3157_v10 }
 0xf40   : > { %3070 = vmatpush3.bf16.msra.mxu1 %v3157_v10 }
 0xfc4   : > { %v2200_v50 = vpop.xlane.xlu0 %2199 }
 0xfc5   : > { %v2210_v48 = vmul.f32 0.03125, %v2200_v50 }
 0xfc6   : > { %v2203_v15 = vpop.xlane.xlu1 %2202 }
 0xfc7   : > { %v2214_v16 = vadd.f32 1e-05, %v2210_v48  ;;  %v2211_v17 = vmul.f32 0.03125, %v2203_v15 }
 0xfc8   : > { %v2206_v20 = vpop.xlane.xlu0 %2205 }
 0xfc9   : > { %3231 = vrsqrt.f32 %v2214_v16  ;;  %v2215_v22 = vadd.f32 1e-05, %v2211_v17  ;;  %v2212_v23 = vmul.f32 0.03125, %v2206_v20 }
 0xfcb   : > { %3233 = vrsqrt.f32 %v2215_v22  ;;  %v2216_v26 = vadd.f32 1e-05, %v2212_v23  ;;  %v2848_v22 = vld [vmem:[%s3917_s0] ss:$0 sm:$0xff] }
 0xfcc   : > { %v2209_v27 = vpop.xlane.xlu1 %2208 }
 0xfcd   : > { %3235 = vrsqrt.f32 %v2216_v26  ;;  %v2213_v31 = vmul.f32 0.03125, %v2209_v27 }
 0xfcf   : > { %v2217_v32 = vadd.f32 1e-05, %v2213_v31 }
 0xfd1   : > { %3237 = vrsqrt.f32 %v2217_v32 }
 0xfd3   : > { %v3232_v42 = vpop.eup %3231 }
 0xfd4   : > { %v2222_v45 = vmul.f32 %v3232_v42, %v3750_v56 }
 0xfd5   : > { %v3234_v38 = vpop.eup %3233 }
 0xfd6   : > { %v2223_v46 = vmul.f32 %v3234_v38, %v2191_v60  ;;  %v2232_v49 = vmul.f32 %v2833_v43, %v2222_v45 }
 0xfd7   : > { %v3236_v37 = vpop.eup %3235 }
 0xfd8   : > { %v2224_v58 = vmul.f32 %v3236_v37, %v3756_v2  ;;  %v2233_v62 = vmul.f32 %v2833_v43, %v2223_v46  ;;  %v2242_v63 = vadd.f32 %v2834_v57, %v2232_v49  ;;  %v3158_v2 = vld [vmem:[%s3431_s2 + $0x38] sm:$0xff]   ;;  %v2552_v37 = vsel (!%p2849_p5), %vm1154_vm5, %v3541_v18, 0.0 }
 0xfd9   : > { %3071 = vmatprep.subr.bf16.mxu1 %v3158_v2  ;;  %v2581_v18 = vsel (!%p2849_p5), %vm1154_vm5, %v3605_v39, 0.0  ;;  %v2602_v39 = vsel (!%p2849_p5), %vm1154_vm5, %v3666_v1, 0.0  ;;  %v2621_v1 = vsel (!%p2849_p5), %vm1154_vm5, %v3701_v13, 0.0 }
 0xfda   : > { %v2243_v3 = vadd.f32 %v2834_v57, %v2233_v62  ;;  %v2234_v40 = vmul.f32 %v2833_v43, %v2224_v58  ;;  %3072 = vmatpush3.bf16.msra.mxu1 %v3158_v2  ;;  %v2561_v58 = vsel (!%p2849_p5), %vm1154_vm5, %v3556_v28, 0.0  ;;  %v2562_v62 = vsel (!%p2849_p5), %vm1154_vm5, %v3558_v29, 0.0 }
 0xfdb   : > { %v3238_v4 = vpop.eup %3237  ;;  %v2592_v28 = vsel (!%p2849_p5), %vm1154_vm5, %v3649_v53, 0.0 }
 0xfdc   : > { %v2225_v56 = vmul.f32 %v3238_v4, %v2193_v7  ;;  %v2246_v35 = vpack.c.bf16 %v2243_v3, %v2242_v63  ;;  %v2244_v5 = vadd.f32 %v2834_v57, %v2234_v40  ;;  %v2835_v7 = vld [vmem:[%s749_s8] ss:$0 sm:$0xff]  ;;  %v2563_v3 = vadd.f32 (!%p2849_p5), %v2562_v62, %v2561_v58 }
 0xfdd   : > { %v2572_v4 = vsel (!%p2849_p5), %vm1154_vm5, %v3595_v25, 0.0  ;;  %v2573_v40 = vsel (!%p2849_p5), %vm1154_vm5, %v3593_v24, 0.0  ;;  %v2601_v24 = vsel (!%p2849_p5), %vm1154_vm5, %v3664_v0, 0.0 }
 0xfde   : > { %v2235_v60 = vmul.f32 %v2833_v43, %v2225_v56  ;;  %3053 = vmatprep.mubr.msk.bf16.mxu0 %vm891_vm2, %v2246_v35  ;;  %v2574_v56 = vadd.f32 (!%p2849_p5), %v2573_v40, %v2572_v4  ;;  %v2564_v29 = vrot.slane (!%p2849_p5), %v2563_v3, 4  ;;  %v2603_v2 = vadd.f32 (!%p2849_p5), %v2602_v39, %v2601_v24  ;;  %v2850_v24 = vld [vmem:[%s3920_s26] ss:$0 sm:$0xff] (!%p2849_p5) }
 0xfe0   : > { %v2245_v6 = vadd.f32 %v2834_v57, %v2235_v60  ;;  %v2553_v57 = vsel (!%p2849_p5), %vm1154_vm5, %v3543_v19, 0.0  ;;  %v2582_v19 = vsel (!%p2849_p5), %vm1154_vm5, %v3607_v41, 0.0  ;;  %v2575_v25 = vrot.slane (!%p2849_p5), %v2574_v56, 4 }
 0xfe1   : > { %v2554_v63 = vadd.f32 (!%p2849_p5), %v2553_v57, %v2552_v37  ;;  %v2583_v60 = vadd.f32 (!%p2849_p5), %v2582_v19, %v2581_v18  ;;  %v2565_v10 = vadd.f32 (!%p2849_p5), %v2564_v29, %v2563_v3 }
 0xfe2   : > { %v2247_v8 = vpack.c.bf16 %v2245_v6, %v2244_v5  ;;  %v2593_v5 = vsel (!%p2849_p5), %vm1154_vm5, %v3651_v55, 0.0  ;;  %v2613_v55 = vsel (!%p2849_p5), %vm1154_vm5, %v3694_v36, 0.0  ;;  %v2622_v36 = vsel (!%p2849_p5), %vm1154_vm5, %v3703_v14, 0.0 }
 0xfe3   : > { %v2555_v35 = vrot.slane (!%p2849_p5), %v2554_v63, 4  ;;  %v2594_v6 = vadd.f32 (!%p2849_p5), %v2593_v5, %v2592_v28  ;;  %v2584_v41 = vrot.slane (!%p2849_p5), %v2583_v60, 4 }
 0xfe4   : > { %3054 = vmatmul.mubr.msk.bf16.vlgmr.msra.gmra.mrb[40].mxu0 %vm891_vm2, %v2247_v8 }
 0xfe5   : > { %v2556_v8 = vadd.f32 (!%p2849_p5), %v2555_v35, %v2554_v63  ;;  %v2595_v53 = vrot.slane (!%p2849_p5), %v2594_v6, 4 }
0x10b7   : > { %v3055_v11 = vpop.f32.mrb[40].mxu0 }
0x10b8   : > { %v2320_v33 = vadd.f32 %v3055_v11, %v2835_v7  ;;  %v2311_v12 = vpop.f32.mrb[41].mxu0  ;;  %v2612_v11 = vsel (!%p2849_p5), %vm1154_vm5, %v3696_v47, 0.0 }
0x10b9   : > { %v2312_v51 = vadd.f32 %v2835_v7, %v2311_v12  ;;  %v3056_v52 = vpop.f32.mrb[42].mxu0  ;;  %v2566_v12 = vrot.slane (!%p2849_p5), %v2565_v10, 2 }
0x10ba   : > { %v2323_v54 = vadd.f32 %v3056_v52, %v2835_v7  ;;  %v2314_v59 = vpop.f32.mrb[43].mxu0  ;;  %v2328_v9 = vmax.f32 %v2320_v33, 0.0  ;;  %v2557_v33 = vrot.slane (!%p2849_p5), %v2556_v8, 2  ;;  %v2604_v52 = vrot.slane (!%p2849_p5), %v2603_v2, 4 }
0x10bb   : > { %v2315_v61 = vadd.f32 %v2835_v7, %v2314_v59  ;;  %v2326_v48 = vmax.f32 %v2312_v51, 0.0  ;;  %v2576_v7 = vadd.f32 (!%p2849_p5), %v2575_v25, %v2574_v56  ;;  %v2585_v51 = vadd.f32 (!%p2849_p5), %v2584_v41, %v2583_v60 }
0x10bc   : > { %v2329_v50 = vmax.f32 %v2323_v54, 0.0  ;;  %v2596_v54 = vadd.f32 (!%p2849_p5), %v2595_v53, %v2594_v6  ;;  %v2614_v59 = vadd.f32 (!%p2849_p5), %v2613_v55, %v2612_v11 }
0x10bd   : > { %v2327_v15 = vmax.f32 %v2315_v61, 0.0  ;;  %v2577_v0 = vrot.slane (!%p2849_p5), %v2576_v7, 2  ;;  %v2558_v61 = vadd.f32 (!%p2849_p5), %v2557_v33, %v2556_v8 }
0x10be   : > { %v2331_v16 = vpack.c.bf16 %v2329_v50, %v2328_v9  ;;  %v2567_v9 = vadd.f32 (!%p2849_p5), %v2566_v12, %v2565_v10  ;;  %v2586_v50 = vrot.slane (!%p2849_p5), %v2585_v51, 2  ;;  %v2615_v47 = vrot.slane (!%p2849_p5), %v2614_v59, 4 }
0x10bf   : > { %v2330_v17 = vpack.c.bf16 %v2327_v15, %v2326_v48  ;;  %v2605_v48 = vadd.f32 (!%p2849_p5), %v2604_v52, %v2603_v2  ;;  %v2578_v15 = vadd.f32 (!%p2849_p5), %v2577_v0, %v2576_v7 }
0x10c1   : > { %3073 = vmatprep.mubr.bf16.mxu1 %v2330_v17  ;;  %v2559_v17 = vrot.slane (!%p2849_p5), %v2558_v61, 1 }
0x10c2   : > { %3074 = vmatmul.mubr.bf16.vlgmr.msra.gmra.mrb[32].mxu1 %v2331_v16  ;;  %v2597_v16 = vrot.slane (!%p2849_p5), %v2596_v54, 2 }
0x1195   : > { %v3075_v20 = vpop.f32.mrb[32].mxu1 }
0x1196   : > { %v2447_v23 = vadd.f32 %v3075_v20, %v3735_v30  ;;  %v2430_v26 = vpop.f32.mrb[33].mxu1  ;;  %v2568_v20 = vrot.slane (!%p2849_p5), %v2567_v9, 1 }
0x1197   : > { %v2445_v27 = vadd.f32 %v2430_v26, %v3733_v21  ;;  %v3076_v31 = vpop.f32.mrb[34].mxu1  ;;  %2467 = sbr.rel (%p2849_p5) target bundleno = 4730 (0x127a), region = 100  ;;  %v3243_v21 = vld [vmem:[%s3918_s21] sm:$0xff] (!%p2849_p5)   ;;  %v2579_v26 = vrot.slane (!%p2849_p5), %v2578_v15, 1 }
0x1198   : > { %v2458_v32 = vadd.f32 %v2848_v22, %v2447_v23  ;;  %v2448_v42 = vadd.f32 %v3076_v31, %v3743_v44  ;;  %v2433_v43 = vpop.f32.mrb[35].mxu1  ;;  %3077 = vmatprep.subr.bf16.mxu0 (!%p2849_p5), %v3243_v21  ;;  %v2606_v23 = vrot.slane (!%p2849_p5), %v2605_v48, 2  ;;  %v2616_v31 = vadd.f32 (!%p2849_p5), %v2615_v47, %v2614_v59 }
0x1199   : > { %v2456_v45 = vadd.f32 %v2848_v22, %v2445_v27  ;;  %v2446_v38 = vadd.f32 %v2433_v43, %v3737_v34  ;;  %v3244_v34 = vld [vmem:[%s3918_s21 + $0x8] sm:$0xff] (!%p2849_p5)   ;;  %3078 = vmatpush3.bf16.msra.mxu0 (!%p2849_p5), %v3243_v21  ;;  %v2598_v27 = vadd.f32 (!%p2849_p5), %v2597_v16, %v2596_v54  ;;  %v2569_v13 = vadd.f32 (!%p2849_p5), %v2568_v20, %v2567_v9 }
0x119a   : > { %2462 = vst.msk [vmem:[#allocation2 + $0x10] sm:$0xff] %vm891_vm2, %v2458_v32  ;;  %v2459_v46 = vadd.f32 %v2848_v22, %v2448_v42  ;;  %3079 = vmatprep.subr.bf16.mxu0 (!%p2849_p5), %v3244_v34  ;;  %v2560_v42 = vadd.f32 (!%p2849_p5), %v2559_v17, %v2558_v61 }
0x119b   : > { %2460 = vst.msk [vmem:[#allocation2] sm:$0xff] %vm891_vm2, %v2456_v45  ;;  %v2457_v49 = vadd.f32 %v2848_v22, %v2446_v38  ;;  %v2587_v22 = vadd.f32 (!%p2849_p5), %v2586_v50, %v2585_v51  ;;  %v2580_v38 = vadd.f32 (!%p2849_p5), %v2579_v26, %v2578_v15 }
0x119c   : > { %2463 = vst.msk [vmem:[#allocation2 + $0x18] sm:$0xff] %vm891_vm2, %v2459_v46  ;;  %v2469_v44 = vpack.c.bf16 (!%p2849_p5), %v2459_v46, %v2458_v32  ;;  %v2623_v32 = vadd.f32 (!%p2849_p5), %v2622_v36, %v2621_v1  ;;  %v2599_v46 = vrot.slane (!%p2849_p5), %v2598_v27, 1 }
0x119d   : > { %2461 = vst.msk [vmem:[#allocation2 + $0x8] sm:$0xff] %vm891_vm2, %v2457_v49  ;;  %v2468_v30 = vpack.c.bf16 (!%p2849_p5), %v2457_v49, %v2456_v45  ;;  %3080 = vmatpush3.bf16.msra.mxu0 (!%p2849_p5), %v3244_v34  ;;  %v2588_v43 = vrot.slane (!%p2849_p5), %v2587_v22, 1  ;;  %v2607_v45 = vadd.f32 (!%p2849_p5), %v2606_v23, %v2605_v48  ;;  %v2617_v49 = vrot.slane (!%p2849_p5), %v2616_v31, 2 }
0x119e   : > { %v2624_v21 = vrot.slane %v2623_v32, 4  ;;  %v2600_v14 = vadd.f32 %v2599_v46, %v2598_v27 }
0x119f   : > { %3081 = vmatprep.mubr.msk.bf16.mxu0 %vm891_vm2, %v2468_v30  ;;  %v2589_v30 = vadd.f32 %v2588_v43, %v2587_v22  ;;  %v2608_v34 = vrot.slane %v2607_v45, 1  ;;  %v2618_v37 = vadd.f32 %v2617_v49, %v2616_v31 }
0x11a0   : > { %3082 = vmatmul.mubr.msk.bf16.vlgmr.msra.gmra.mrb[0].mxu0 %vm891_vm2, %v2469_v44  ;;  %v2590_v44 = vadd.f32 %v2580_v38, %v2560_v42  ;;  %v2625_v57 = vadd.f32 %v2624_v21, %v2623_v32 }
0x11a1   : > { %v2591_v58 = vadd.f32 %v2589_v30, %v2569_v13  ;;  %v2609_v62 = vadd.f32 %v2608_v34, %v2607_v45  ;;  %v2619_v3 = vrot.slane %v2618_v37, 1 }
0x11a2   : > { %v2610_v63 = vadd.f32 %v2600_v14, %v2590_v44  ;;  %v2626_v4 = vrot.slane %v2625_v57, 2 }
0x11a3   : > { %v2620_v40 = vadd.f32 %v2619_v3, %v2618_v37  ;;  %v2611_v18 = vadd.f32 %v2609_v62, %v2591_v58 }
0x11a4   : > { %v2627_v56 = vadd.f32 %v2626_v4, %v2625_v57 }
0x11a5   : > { %v2630_v28 = vadd.f32 %v2620_v40, %v2610_v63 }
0x11a6   : > { %v2628_v19 = vrot.slane %v2627_v56, 1 }
0x11a7   : > { %v2632_v60 = vmul.f32 0.015625, %v2630_v28 }
0x11a8   : > { %v2629_v35 = vadd.f32 %v2628_v19, %v2627_v56 }
0x11aa   : > { %v2631_v29 = vadd.f32 %v2629_v35, %v2611_v18 }
0x11ac   : > { %v2633_v5 = vmul.f32 0.015625, %v2631_v29 }
0x11ae   : > { %v2637_v25 = vsel %vm2636_vm7, %v2633_v5, %v2632_v60 }
0x11af   : > { %v2639_v6 = vsel %vm1154_vm5, %v2637_v25, 0.0 }
0x11b0   : > { %2640 = vst [vmem:[%s3919_s22] sm:$0x3] %v2639_v6 }
0x1273   : > { %v3083_v39 = vpop.f32.mrb[0].mxu0 }
0x1274   : > { %v2542_v8 = vadd.f32 %v3083_v39, %v2850_v24  ;;  %v2533_v10 = vpop.f32.mrb[1].mxu0 }
0x1275   : > { %v2534_v41 = vadd.f32 %v2850_v24, %v2533_v10  ;;  %v3084_v2 = vpop.f32.mrb[2].mxu0 }
0x1276   : > { %2550 = vst [vmem:[%s3921_s19 + $0x10] sm:$0xff] %v2542_v8  ;;  %v2545_v7 = vadd.f32 %v3084_v2, %v2850_v24  ;;  %v2536_v53 = vpop.f32.mrb[3].mxu0 }
0x1277   : > { %2548 = vst [vmem:[%s3921_s19] sm:$0xff] %v2534_v41  ;;  %v2537_v11 = vadd.f32 %v2850_v24, %v2536_v53 }
0x1278   : > { %2551 = vst [vmem:[%s3921_s19 + $0x18] sm:$0xff] %v2545_v7 }
0x1279   : > { %2549 = vst [vmem:[%s3921_s19 + $0x8] sm:$0xff] %v2537_v11 }
0x127a PF: > { %s3922_s16 = sld [smem:[#allocation3_spill]] }
0x1280   : > { %s30_s0 = sadd.s32 1, %s3922_s16  }
0x1281   : > { %p27_p6 = scmp.ge.s32.totalorder %s30_s0, 4  }
0x1283   :  { %29 = sbr.rel (!%p27_p6) target bundleno = 11 (0xb), region = 167 }

</bundles_post_ra>
